<compile_context>
chip_gen: v6e
topology: v6e:2x2x1
jax: 0.10.0
libtpu: 0.0.40
codegen_flags: <defaults>
</compile_context>

<pallas_src>
import functools

import jax
import jax.numpy as jnp
from jax import lax
from jax.experimental import pallas as pl
from jax.experimental.pallas import tpu as pltpu  # noqa: F401  (TPU backend)
import numpy as np

# ---------------- problem sizes (small, consistent with the module) ----------
TAM_VOCAB = 50
TAM_EMBEDDING = 16
HIDDEN_SIZE = 32
OUTPUT_SIZE = 3
BATCH = 4
SEQ_LEN = 8
IND_PAD = 0
IND_UNK = 1

BATCH_PAD = 8          # sublane-friendly batch
OUT_PAD = 128          # lane-dense linear output


# ---------------------------- Pallas kernel ----------------------------------
def rnn_kernel(tok_ref, lens_ref, table_ref,
               wih_r_ref, wih_z_ref, wih_n_ref,
               whh_r_ref, whh_z_ref, whh_n_ref,
               b_r_ref, b_z_ref, b_in_ref, b_hn_ref,
               wlin_ref, blin_ref, o_ref,
               *, seq_len, batch_p, hidden, vocab):
    """Embedding (one-hot matmul) + GRU recurrence + Linear, all in VMEM."""
    S, Bp, H, V = seq_len, batch_p, hidden, vocab

    # ---- embedding lookup as a one-hot matmul on the MXU ----
    tok = tok_ref[...]                                            # (S*Bp, 1) i32
    vocab_iota = lax.broadcasted_iota(jnp.int32, (S * Bp, V), 1)  # (S*Bp, V)
    onehot = (tok == vocab_iota).astype(jnp.float32)
    emb2d = jnp.dot(onehot, table_ref[...],
                    preferred_element_type=jnp.float32)           # (S*Bp, E)

    # ---- hoisted input projection: one matmul per gate over ALL timesteps ----
    gi_r = jnp.dot(emb2d, wih_r_ref[...],
                   preferred_element_type=jnp.float32) + b_r_ref[...]
    gi_z = jnp.dot(emb2d, wih_z_ref[...],
                   preferred_element_type=jnp.float32) + b_z_ref[...]
    gi_n = jnp.dot(emb2d, wih_n_ref[...],
                   preferred_element_type=jnp.float32) + b_in_ref[...]

    whh_r = whh_r_ref[...]
    whh_z = whh_z_ref[...]
    whh_n = whh_n_ref[...]
    b_hn = b_hn_ref[...]
    lens = lens_ref[...]                                          # (Bp, 1) i32

    h = jnp.zeros((Bp, H), jnp.float32)                           # zero init hidden

    # ---- fully-unrolled serial recurrence (static, aligned sublane slices) ----
    for t in range(S):
        gr = gi_r[t * Bp:(t + 1) * Bp, :]
        gz = gi_z[t * Bp:(t + 1) * Bp, :]
        gn = gi_n[t * Bp:(t + 1) * Bp, :]

        gh_r = jnp.dot(h, whh_r, preferred_element_type=jnp.float32)
        gh_z = jnp.dot(h, whh_z, preferred_element_type=jnp.float32)
        gh_n = jnp.dot(h, whh_n, preferred_element_type=jnp.float32) + b_hn

        r = jax.nn.sigmoid(gr + gh_r)
        z = jax.nn.sigmoid(gz + gh_z)
        n = jnp.tanh(gn + r * gh_n)

        h_new = h + (1.0 - z) * (n - h)                           # (1-z)*n + z*h

        # pack_padded_sequence semantics: only update sequences still "alive".
        m = (lens > t).astype(jnp.float32)                        # (Bp, 1)
        h = h + m * (h_new - h)

    # output = self.linear(hidden.squeeze()); lane-dense (Bp, 128) store.
    o_ref[...] = (jnp.dot(h, wlin_ref[...],
                          preferred_element_type=jnp.float32) + blin_ref[...])


def rnn_forward_pallas(tokens, lens, table, wih, whh, bih, bhh, wlin, blin):
    """tokens: (S, B) int32 ids; lens: (B,) int32 lengths; table: (V, E) f32."""
    S, B = tokens.shape
    V, E = table.shape
    H = whh.shape[0]
    O = wlin.shape[1]
    Bp, Op = BATCH_PAD, OUT_PAD

    # Batch-pad tokens with <pad>; padded rows get length 0 (mask always off).
    tok_p = jnp.full((S, Bp), IND_PAD, jnp.int32).at[:, :B].set(tokens)
    lens_p = jnp.zeros((Bp,), jnp.int32).at[:B].set(lens)

    # Per-gate weight split (PyTorch gate order r, z, n) + folded r/z biases.
    wih_r, wih_z, wih_n = wih[:, :H], wih[:, H:2 * H], wih[:, 2 * H:]
    whh_r, whh_z, whh_n = whh[:, :H], whh[:, H:2 * H], whh[:, 2 * H:]
    b_r = bih[:, :H] + bhh[:, :H]
    b_z = bih[:, H:2 * H] + bhh[:, H:2 * H]
    b_in = bih[:, 2 * H:]
    b_hn = bhh[:, 2 * H:]

    # Lane-dense Linear weights (pad output dim 3 -> 128, slice outside).
    wlin_p = jnp.zeros((H, Op), jnp.float32).at[:, :O].set(wlin)
    blin_p = jnp.zeros((1, Op), jnp.float32).at[:, :O].set(blin)

    tok2d = tok_p.reshape(S * Bp, 1)
    lens2d = lens_p.reshape(Bp, 1)

    kernel = functools.partial(rnn_kernel,
                               seq_len=S, batch_p=Bp, hidden=H, vocab=V)

    out_p = pl.pallas_call(
        kernel,
        out_shape=jax.ShapeDtypeStruct((Bp, Op), jnp.float32),
    )(tok2d, lens2d, table,
      wih_r, wih_z, wih_n,
      whh_r, whh_z, whh_n,
      b_r, b_z, b_in, b_hn,
      wlin_p, blin_p)

    return out_p[:B, :O]


# ------------------------- pure-JAX reference --------------------------------
def rnn_forward_ref(emb, lens, wih, whh, bih, bhh, wlin, blin):
    H = whh.shape[0]
    B = emb.shape[1]

    def step(h, inp):
        x_t, t = inp
        gi = x_t @ wih + bih
        gh = h @ whh + bhh
        r = jax.nn.sigmoid(gi[:, :H] + gh[:, :H])
        z = jax.nn.sigmoid(gi[:, H:2 * H] + gh[:, H:2 * H])
        n = jnp.tanh(gi[:, 2 * H:] + r * gh[:, 2 * H:])
        h_new = (1.0 - z) * n + z * h
        h = jnp.where((lens > t)[:, None], h_new, h)
        return h, None

    h0 = jnp.zeros((B, H), jnp.float32)
    hT, _ = lax.scan(step, h0, (emb, jnp.arange(emb.shape[0])))
    return hT @ wlin + blin


# --------------------------------- main ---------------------------------------
if __name__ == "__main__":
    key = jax.random.PRNGKey(0)
    k_emb, k_ih, k_hh, k_bih, k_bhh, k_lin, k_blin, k_x = jax.random.split(key, 8)

    # Embedding table ~ torch.rand(tam_vocab, tam_embedding), <unk>/<pad> zeroed
    embed_table = jax.random.uniform(k_emb, (TAM_VOCAB, TAM_EMBEDDING), jnp.float32)
    embed_table = embed_table.at[IND_UNK].set(0.0)
    embed_table = embed_table.at[IND_PAD].set(0.0)

    # GRU params (stored pre-transposed: (in, 3H) / (H, 3H)); gate order r,z,n
    scale = 1.0 / np.sqrt(HIDDEN_SIZE)
    wih = jax.random.uniform(k_ih, (TAM_EMBEDDING, 3 * HIDDEN_SIZE), jnp.float32,
                             -scale, scale)
    whh = jax.random.uniform(k_hh, (HIDDEN_SIZE, 3 * HIDDEN_SIZE), jnp.float32,
                             -scale, scale)
    bih = jax.random.uniform(k_bih, (1, 3 * HIDDEN_SIZE), jnp.float32, -scale, scale)
    bhh = jax.random.uniform(k_bhh, (1, 3 * HIDDEN_SIZE), jnp.float32, -scale, scale)

    # Linear params
    wlin = jax.random.uniform(k_lin, (HIDDEN_SIZE, OUTPUT_SIZE), jnp.float32,
                              -scale, scale)
    blin = jax.random.uniform(k_blin, (1, OUTPUT_SIZE), jnp.float32, -scale, scale)

    # Inputs: X (seq_len, batch) int32 token ids, tamanhos sorted descending
    X = jax.random.randint(k_x, (SEQ_LEN, BATCH), 0, TAM_VOCAB, dtype=jnp.int32)
    tamanhos = jnp.array([8, 6, 5, 3], dtype=jnp.int32)      # descending, max == SEQ_LEN

    # Positions past each sequence length are <pad> tokens
    time_idx = jnp.arange(SEQ_LEN)[:, None]
    X = jnp.where(time_idx < tamanhos[None, :], X, IND_PAD)

    # Kernel consumes raw token ids (embedding gather is done inside the kernel).
    out = rnn_forward_pallas(X, tamanhos, embed_table,
                             wih, whh, bih, bhh, wlin, blin)
    out = jax.block_until_ready(out)

    # Reference: plain-JAX embedding lookup + scan GRU + linear.
    emb = embed_table[X]                                      # (S, B, E) f32
    ref = rnn_forward_ref(emb, tamanhos, wih, whh, bih, bhh, wlin, blin)
    np.testing.assert_allclose(np.asarray(out), np.asarray(ref),
                               rtol=1e-5, atol=1e-5)

    print("KERNEL_OK")
</pallas_src>

<mosaic_0001>
module attributes {stable_mosaic.version = 11 : i64} {
  func.func @rnn_kernel(%arg0: memref<64x1xi32, #tpu.memory_space<vmem>>, %arg1: memref<8x1xi32, #tpu.memory_space<vmem>>, %arg2: memref<50x16xf32, #tpu.memory_space<vmem>>, %arg3: memref<16x32xf32, #tpu.memory_space<vmem>>, %arg4: memref<16x32xf32, #tpu.memory_space<vmem>>, %arg5: memref<16x32xf32, #tpu.memory_space<vmem>>, %arg6: memref<32x32xf32, #tpu.memory_space<vmem>>, %arg7: memref<32x32xf32, #tpu.memory_space<vmem>>, %arg8: memref<32x32xf32, #tpu.memory_space<vmem>>, %arg9: memref<1x32xf32, #tpu.memory_space<vmem>>, %arg10: memref<1x32xf32, #tpu.memory_space<vmem>>, %arg11: memref<1x32xf32, #tpu.memory_space<vmem>>, %arg12: memref<1x32xf32, #tpu.memory_space<vmem>>, %arg13: memref<32x128xf32, #tpu.memory_space<vmem>>, %arg14: memref<1x128xf32, #tpu.memory_space<vmem>>, %arg15: memref<8x128xf32, #tpu.memory_space<vmem>>) attributes {dimension_semantics = [], scalar_prefetch = 0 : i64, scratch_operands = 0 : i64, tpu.core_type = #tpu.core_type<tc>} {
    %c0 = arith.constant 0 : index
    %c0_0 = arith.constant 0 : index
    %0 = vector.load %arg0[%c0, %c0_0] : memref<64x1xi32, #tpu.memory_space<vmem>>, vector<64x1xi32>
    %1 = tpu.iota {dimensions = array<i32: 1>} : vector<64x50xi32>
    %2 = vector.broadcast %0 : vector<64x1xi32> to vector<64x50xi32>
    %3 = arith.cmpi eq, %2, %1 : vector<64x50xi32>
    %4 = arith.extui %3 : vector<64x50xi1> to vector<64x50xi32>
    %5 = arith.sitofp %4 : vector<64x50xi32> to vector<64x50xf32>
    %c0_1 = arith.constant 0 : index
    %c0_2 = arith.constant 0 : index
    %6 = vector.load %arg2[%c0_1, %c0_2] : memref<50x16xf32, #tpu.memory_space<vmem>>, vector<50x16xf32>
    %cst = arith.constant dense<0.000000e+00> : vector<64x16xf32>
    %7 = tpu.matmul %5, %6, %cst {dimension_numbers = #tpu.dot_dimension_numbers<[1], [0], [0], [1], [0, 0, 1, 1], [], []>} : vector<64x50xf32>, vector<50x16xf32>, vector<64x16xf32> -> vector<64x16xf32>
    %c0_3 = arith.constant 0 : index
    %c0_4 = arith.constant 0 : index
    %8 = vector.load %arg3[%c0_3, %c0_4] : memref<16x32xf32, #tpu.memory_space<vmem>>, vector<16x32xf32>
    %cst_5 = arith.constant dense<0.000000e+00> : vector<64x32xf32>
    %9 = tpu.matmul %7, %8, %cst_5 {dimension_numbers = #tpu.dot_dimension_numbers<[1], [0], [0], [1], [0, 0, 1, 1], [], []>} : vector<64x16xf32>, vector<16x32xf32>, vector<64x32xf32> -> vector<64x32xf32>
    %c0_6 = arith.constant 0 : index
    %c0_7 = arith.constant 0 : index
    %10 = vector.load %arg9[%c0_6, %c0_7] : memref<1x32xf32, #tpu.memory_space<vmem>>, vector<1x32xf32>
    %11 = vector.broadcast %10 : vector<1x32xf32> to vector<64x32xf32>
    %12 = arith.addf %9, %11 : vector<64x32xf32>
    %c0_8 = arith.constant 0 : index
    %c0_9 = arith.constant 0 : index
    %13 = vector.load %arg4[%c0_8, %c0_9] : memref<16x32xf32, #tpu.memory_space<vmem>>, vector<16x32xf32>
    %cst_10 = arith.constant dense<0.000000e+00> : vector<64x32xf32>
    %14 = tpu.matmul %7, %13, %cst_10 {dimension_numbers = #tpu.dot_dimension_numbers<[1], [0], [0], [1], [0, 0, 1, 1], [], []>} : vector<64x16xf32>, vector<16x32xf32>, vector<64x32xf32> -> vector<64x32xf32>
    %c0_11 = arith.constant 0 : index
    %c0_12 = arith.constant 0 : index
    %15 = vector.load %arg10[%c0_11, %c0_12] : memref<1x32xf32, #tpu.memory_space<vmem>>, vector<1x32xf32>
    %16 = vector.broadcast %15 : vector<1x32xf32> to vector<64x32xf32>
    %17 = arith.addf %14, %16 : vector<64x32xf32>
    %c0_13 = arith.constant 0 : index
    %c0_14 = arith.constant 0 : index
    %18 = vector.load %arg5[%c0_13, %c0_14] : memref<16x32xf32, #tpu.memory_space<vmem>>, vector<16x32xf32>
    %cst_15 = arith.constant dense<0.000000e+00> : vector<64x32xf32>
    %19 = tpu.matmul %7, %18, %cst_15 {dimension_numbers = #tpu.dot_dimension_numbers<[1], [0], [0], [1], [0, 0, 1, 1], [], []>} : vector<64x16xf32>, vector<16x32xf32>, vector<64x32xf32> -> vector<64x32xf32>
    %c0_16 = arith.constant 0 : index
    %c0_17 = arith.constant 0 : index
    %20 = vector.load %arg11[%c0_16, %c0_17] : memref<1x32xf32, #tpu.memory_space<vmem>>, vector<1x32xf32>
    %21 = vector.broadcast %20 : vector<1x32xf32> to vector<64x32xf32>
    %22 = arith.addf %19, %21 : vector<64x32xf32>
    %c0_18 = arith.constant 0 : index
    %c0_19 = arith.constant 0 : index
    %23 = vector.load %arg6[%c0_18, %c0_19] : memref<32x32xf32, #tpu.memory_space<vmem>>, vector<32x32xf32>
    %c0_20 = arith.constant 0 : index
    %c0_21 = arith.constant 0 : index
    %24 = vector.load %arg7[%c0_20, %c0_21] : memref<32x32xf32, #tpu.memory_space<vmem>>, vector<32x32xf32>
    %c0_22 = arith.constant 0 : index
    %c0_23 = arith.constant 0 : index
    %25 = vector.load %arg8[%c0_22, %c0_23] : memref<32x32xf32, #tpu.memory_space<vmem>>, vector<32x32xf32>
    %c0_24 = arith.constant 0 : index
    %c0_25 = arith.constant 0 : index
    %26 = vector.load %arg12[%c0_24, %c0_25] : memref<1x32xf32, #tpu.memory_space<vmem>>, vector<1x32xf32>
    %c0_26 = arith.constant 0 : index
    %c0_27 = arith.constant 0 : index
    %27 = vector.load %arg1[%c0_26, %c0_27] : memref<8x1xi32, #tpu.memory_space<vmem>>, vector<8x1xi32>
    %cst_28 = arith.constant 0.000000e+00 : f32
    %28 = vector.broadcast %cst_28 : f32 to vector<8x32xf32>
    %29 = vector.extract_strided_slice %12 {offsets = [0, 0], sizes = [8, 32], strides = [1, 1]} : vector<64x32xf32> to vector<8x32xf32>
    %30 = vector.extract_strided_slice %17 {offsets = [0, 0], sizes = [8, 32], strides = [1, 1]} : vector<64x32xf32> to vector<8x32xf32>
    %31 = vector.extract_strided_slice %22 {offsets = [0, 0], sizes = [8, 32], strides = [1, 1]} : vector<64x32xf32> to vector<8x32xf32>
    %cst_29 = arith.constant dense<0.000000e+00> : vector<8x32xf32>
    %32 = tpu.matmul %28, %23, %cst_29 {dimension_numbers = #tpu.dot_dimension_numbers<[1], [0], [0], [1], [0, 0, 1, 1], [], []>} : vector<8x32xf32>, vector<32x32xf32>, vector<8x32xf32> -> vector<8x32xf32>
    %cst_30 = arith.constant dense<0.000000e+00> : vector<8x32xf32>
    %33 = tpu.matmul %28, %24, %cst_30 {dimension_numbers = #tpu.dot_dimension_numbers<[1], [0], [0], [1], [0, 0, 1, 1], [], []>} : vector<8x32xf32>, vector<32x32xf32>, vector<8x32xf32> -> vector<8x32xf32>
    %cst_31 = arith.constant dense<0.000000e+00> : vector<8x32xf32>
    %34 = tpu.matmul %28, %25, %cst_31 {dimension_numbers = #tpu.dot_dimension_numbers<[1], [0], [0], [1], [0, 0, 1, 1], [], []>} : vector<8x32xf32>, vector<32x32xf32>, vector<8x32xf32> -> vector<8x32xf32>
    %35 = vector.broadcast %26 : vector<1x32xf32> to vector<8x32xf32>
    %36 = arith.addf %34, %35 : vector<8x32xf32>
    %37 = arith.addf %29, %32 : vector<8x32xf32>
    %38 = arith.negf %37 : vector<8x32xf32>
    %39 = math.exp %38 : vector<8x32xf32>
    %cst_32 = arith.constant 1.000000e+00 : f32
    %40 = vector.broadcast %cst_32 : f32 to vector<8x32xf32>
    %41 = arith.addf %40, %39 : vector<8x32xf32>
    %42 = arith.divf %40, %41 : vector<8x32xf32>
    %43 = arith.addf %30, %33 : vector<8x32xf32>
    %44 = arith.negf %43 : vector<8x32xf32>
    %45 = math.exp %44 : vector<8x32xf32>
    %cst_33 = arith.constant 1.000000e+00 : f32
    %46 = vector.broadcast %cst_33 : f32 to vector<8x32xf32>
    %47 = arith.addf %46, %45 : vector<8x32xf32>
    %48 = arith.divf %46, %47 : vector<8x32xf32>
    %49 = arith.mulf %42, %36 : vector<8x32xf32>
    %50 = arith.addf %31, %49 : vector<8x32xf32>
    %51 = math.tanh %50 : vector<8x32xf32>
    %cst_34 = arith.constant 1.000000e+00 : f32
    %52 = vector.broadcast %cst_34 : f32 to vector<8x32xf32>
    %53 = arith.subf %52, %48 : vector<8x32xf32>
    %54 = arith.subf %51, %28 : vector<8x32xf32>
    %55 = arith.mulf %53, %54 : vector<8x32xf32>
    %56 = arith.addf %28, %55 : vector<8x32xf32>
    %c0_i32 = arith.constant 0 : i32
    %57 = vector.broadcast %c0_i32 : i32 to vector<8x1xi32>
    %58 = arith.cmpi sgt, %27, %57 : vector<8x1xi32>
    %59 = arith.extui %58 : vector<8x1xi1> to vector<8x1xi32>
    %60 = arith.sitofp %59 : vector<8x1xi32> to vector<8x1xf32>
    %61 = arith.subf %56, %28 : vector<8x32xf32>
    %62 = vector.broadcast %60 : vector<8x1xf32> to vector<8x32xf32>
    %63 = arith.mulf %62, %61 : vector<8x32xf32>
    %64 = arith.addf %28, %63 : vector<8x32xf32>
    %65 = vector.extract_strided_slice %12 {offsets = [8, 0], sizes = [8, 32], strides = [1, 1]} : vector<64x32xf32> to vector<8x32xf32>
    %66 = vector.extract_strided_slice %17 {offsets = [8, 0], sizes = [8, 32], strides = [1, 1]} : vector<64x32xf32> to vector<8x32xf32>
    %67 = vector.extract_strided_slice %22 {offsets = [8, 0], sizes = [8, 32], strides = [1, 1]} : vector<64x32xf32> to vector<8x32xf32>
    %cst_35 = arith.constant dense<0.000000e+00> : vector<8x32xf32>
    %68 = tpu.matmul %64, %23, %cst_35 {dimension_numbers = #tpu.dot_dimension_numbers<[1], [0], [0], [1], [0, 0, 1, 1], [], []>} : vector<8x32xf32>, vector<32x32xf32>, vector<8x32xf32> -> vector<8x32xf32>
    %cst_36 = arith.constant dense<0.000000e+00> : vector<8x32xf32>
    %69 = tpu.matmul %64, %24, %cst_36 {dimension_numbers = #tpu.dot_dimension_numbers<[1], [0], [0], [1], [0, 0, 1, 1], [], []>} : vector<8x32xf32>, vector<32x32xf32>, vector<8x32xf32> -> vector<8x32xf32>
    %cst_37 = arith.constant dense<0.000000e+00> : vector<8x32xf32>
    %70 = tpu.matmul %64, %25, %cst_37 {dimension_numbers = #tpu.dot_dimension_numbers<[1], [0], [0], [1], [0, 0, 1, 1], [], []>} : vector<8x32xf32>, vector<32x32xf32>, vector<8x32xf32> -> vector<8x32xf32>
    %71 = vector.broadcast %26 : vector<1x32xf32> to vector<8x32xf32>
    %72 = arith.addf %70, %71 : vector<8x32xf32>
    %73 = arith.addf %65, %68 : vector<8x32xf32>
    %74 = arith.negf %73 : vector<8x32xf32>
    %75 = math.exp %74 : vector<8x32xf32>
    %cst_38 = arith.constant 1.000000e+00 : f32
    %76 = vector.broadcast %cst_38 : f32 to vector<8x32xf32>
    %77 = arith.addf %76, %75 : vector<8x32xf32>
    %78 = arith.divf %76, %77 : vector<8x32xf32>
    %79 = arith.addf %66, %69 : vector<8x32xf32>
    %80 = arith.negf %79 : vector<8x32xf32>
    %81 = math.exp %80 : vector<8x32xf32>
    %cst_39 = arith.constant 1.000000e+00 : f32
    %82 = vector.broadcast %cst_39 : f32 to vector<8x32xf32>
    %83 = arith.addf %82, %81 : vector<8x32xf32>
    %84 = arith.divf %82, %83 : vector<8x32xf32>
    %85 = arith.mulf %78, %72 : vector<8x32xf32>
    %86 = arith.addf %67, %85 : vector<8x32xf32>
    %87 = math.tanh %86 : vector<8x32xf32>
    %cst_40 = arith.constant 1.000000e+00 : f32
    %88 = vector.broadcast %cst_40 : f32 to vector<8x32xf32>
    %89 = arith.subf %88, %84 : vector<8x32xf32>
    %90 = arith.subf %87, %64 : vector<8x32xf32>
    %91 = arith.mulf %89, %90 : vector<8x32xf32>
    %92 = arith.addf %64, %91 : vector<8x32xf32>
    %c1_i32 = arith.constant 1 : i32
    %93 = vector.broadcast %c1_i32 : i32 to vector<8x1xi32>
    %94 = arith.cmpi sgt, %27, %93 : vector<8x1xi32>
    %95 = arith.extui %94 : vector<8x1xi1> to vector<8x1xi32>
    %96 = arith.sitofp %95 : vector<8x1xi32> to vector<8x1xf32>
    %97 = arith.subf %92, %64 : vector<8x32xf32>
    %98 = vector.broadcast %96 : vector<8x1xf32> to vector<8x32xf32>
    %99 = arith.mulf %98, %97 : vector<8x32xf32>
    %100 = arith.addf %64, %99 : vector<8x32xf32>
    %101 = vector.extract_strided_slice %12 {offsets = [16, 0], sizes = [8, 32], strides = [1, 1]} : vector<64x32xf32> to vector<8x32xf32>
    %102 = vector.extract_strided_slice %17 {offsets = [16, 0], sizes = [8, 32], strides = [1, 1]} : vector<64x32xf32> to vector<8x32xf32>
    %103 = vector.extract_strided_slice %22 {offsets = [16, 0], sizes = [8, 32], strides = [1, 1]} : vector<64x32xf32> to vector<8x32xf32>
    %cst_41 = arith.constant dense<0.000000e+00> : vector<8x32xf32>
    %104 = tpu.matmul %100, %23, %cst_41 {dimension_numbers = #tpu.dot_dimension_numbers<[1], [0], [0], [1], [0, 0, 1, 1], [], []>} : vector<8x32xf32>, vector<32x32xf32>, vector<8x32xf32> -> vector<8x32xf32>
    %cst_42 = arith.constant dense<0.000000e+00> : vector<8x32xf32>
    %105 = tpu.matmul %100, %24, %cst_42 {dimension_numbers = #tpu.dot_dimension_numbers<[1], [0], [0], [1], [0, 0, 1, 1], [], []>} : vector<8x32xf32>, vector<32x32xf32>, vector<8x32xf32> -> vector<8x32xf32>
    %cst_43 = arith.constant dense<0.000000e+00> : vector<8x32xf32>
    %106 = tpu.matmul %100, %25, %cst_43 {dimension_numbers = #tpu.dot_dimension_numbers<[1], [0], [0], [1], [0, 0, 1, 1], [], []>} : vector<8x32xf32>, vector<32x32xf32>, vector<8x32xf32> -> vector<8x32xf32>
    %107 = vector.broadcast %26 : vector<1x32xf32> to vector<8x32xf32>
    %108 = arith.addf %106, %107 : vector<8x32xf32>
    %109 = arith.addf %101, %104 : vector<8x32xf32>
    %110 = arith.negf %109 : vector<8x32xf32>
    %111 = math.exp %110 : vector<8x32xf32>
    %cst_44 = arith.constant 1.000000e+00 : f32
    %112 = vector.broadcast %cst_44 : f32 to vector<8x32xf32>
    %113 = arith.addf %112, %111 : vector<8x32xf32>
    %114 = arith.divf %112, %113 : vector<8x32xf32>
    %115 = arith.addf %102, %105 : vector<8x32xf32>
    %116 = arith.negf %115 : vector<8x32xf32>
    %117 = math.exp %116 : vector<8x32xf32>
    %cst_45 = arith.constant 1.000000e+00 : f32
    %118 = vector.broadcast %cst_45 : f32 to vector<8x32xf32>
    %119 = arith.addf %118, %117 : vector<8x32xf32>
    %120 = arith.divf %118, %119 : vector<8x32xf32>
    %121 = arith.mulf %114, %108 : vector<8x32xf32>
    %122 = arith.addf %103, %121 : vector<8x32xf32>
    %123 = math.tanh %122 : vector<8x32xf32>
    %cst_46 = arith.constant 1.000000e+00 : f32
    %124 = vector.broadcast %cst_46 : f32 to vector<8x32xf32>
    %125 = arith.subf %124, %120 : vector<8x32xf32>
    %126 = arith.subf %123, %100 : vector<8x32xf32>
    %127 = arith.mulf %125, %126 : vector<8x32xf32>
    %128 = arith.addf %100, %127 : vector<8x32xf32>
    %c2_i32 = arith.constant 2 : i32
    %129 = vector.broadcast %c2_i32 : i32 to vector<8x1xi32>
    %130 = arith.cmpi sgt, %27, %129 : vector<8x1xi32>
    %131 = arith.extui %130 : vector<8x1xi1> to vector<8x1xi32>
    %132 = arith.sitofp %131 : vector<8x1xi32> to vector<8x1xf32>
    %133 = arith.subf %128, %100 : vector<8x32xf32>
    %134 = vector.broadcast %132 : vector<8x1xf32> to vector<8x32xf32>
    %135 = arith.mulf %134, %133 : vector<8x32xf32>
    %136 = arith.addf %100, %135 : vector<8x32xf32>
    %137 = vector.extract_strided_slice %12 {offsets = [24, 0], sizes = [8, 32], strides = [1, 1]} : vector<64x32xf32> to vector<8x32xf32>
    %138 = vector.extract_strided_slice %17 {offsets = [24, 0], sizes = [8, 32], strides = [1, 1]} : vector<64x32xf32> to vector<8x32xf32>
    %139 = vector.extract_strided_slice %22 {offsets = [24, 0], sizes = [8, 32], strides = [1, 1]} : vector<64x32xf32> to vector<8x32xf32>
    %cst_47 = arith.constant dense<0.000000e+00> : vector<8x32xf32>
    %140 = tpu.matmul %136, %23, %cst_47 {dimension_numbers = #tpu.dot_dimension_numbers<[1], [0], [0], [1], [0, 0, 1, 1], [], []>} : vector<8x32xf32>, vector<32x32xf32>, vector<8x32xf32> -> vector<8x32xf32>
    %cst_48 = arith.constant dense<0.000000e+00> : vector<8x32xf32>
    %141 = tpu.matmul %136, %24, %cst_48 {dimension_numbers = #tpu.dot_dimension_numbers<[1], [0], [0], [1], [0, 0, 1, 1], [], []>} : vector<8x32xf32>, vector<32x32xf32>, vector<8x32xf32> -> vector<8x32xf32>
    %cst_49 = arith.constant dense<0.000000e+00> : vector<8x32xf32>
    %142 = tpu.matmul %136, %25, %cst_49 {dimension_numbers = #tpu.dot_dimension_numbers<[1], [0], [0], [1], [0, 0, 1, 1], [], []>} : vector<8x32xf32>, vector<32x32xf32>, vector<8x32xf32> -> vector<8x32xf32>
    %143 = vector.broadcast %26 : vector<1x32xf32> to vector<8x32xf32>
    %144 = arith.addf %142, %143 : vector<8x32xf32>
    %145 = arith.addf %137, %140 : vector<8x32xf32>
    %146 = arith.negf %145 : vector<8x32xf32>
    %147 = math.exp %146 : vector<8x32xf32>
    %cst_50 = arith.constant 1.000000e+00 : f32
    %148 = vector.broadcast %cst_50 : f32 to vector<8x32xf32>
    %149 = arith.addf %148, %147 : vector<8x32xf32>
    %150 = arith.divf %148, %149 : vector<8x32xf32>
    %151 = arith.addf %138, %141 : vector<8x32xf32>
    %152 = arith.negf %151 : vector<8x32xf32>
    %153 = math.exp %152 : vector<8x32xf32>
    %cst_51 = arith.constant 1.000000e+00 : f32
    %154 = vector.broadcast %cst_51 : f32 to vector<8x32xf32>
    %155 = arith.addf %154, %153 : vector<8x32xf32>
    %156 = arith.divf %154, %155 : vector<8x32xf32>
    %157 = arith.mulf %150, %144 : vector<8x32xf32>
    %158 = arith.addf %139, %157 : vector<8x32xf32>
    %159 = math.tanh %158 : vector<8x32xf32>
    %cst_52 = arith.constant 1.000000e+00 : f32
    %160 = vector.broadcast %cst_52 : f32 to vector<8x32xf32>
    %161 = arith.subf %160, %156 : vector<8x32xf32>
    %162 = arith.subf %159, %136 : vector<8x32xf32>
    %163 = arith.mulf %161, %162 : vector<8x32xf32>
    %164 = arith.addf %136, %163 : vector<8x32xf32>
    %c3_i32 = arith.constant 3 : i32
    %165 = vector.broadcast %c3_i32 : i32 to vector<8x1xi32>
    %166 = arith.cmpi sgt, %27, %165 : vector<8x1xi32>
    %167 = arith.extui %166 : vector<8x1xi1> to vector<8x1xi32>
    %168 = arith.sitofp %167 : vector<8x1xi32> to vector<8x1xf32>
    %169 = arith.subf %164, %136 : vector<8x32xf32>
    %170 = vector.broadcast %168 : vector<8x1xf32> to vector<8x32xf32>
    %171 = arith.mulf %170, %169 : vector<8x32xf32>
    %172 = arith.addf %136, %171 : vector<8x32xf32>
    %173 = vector.extract_strided_slice %12 {offsets = [32, 0], sizes = [8, 32], strides = [1, 1]} : vector<64x32xf32> to vector<8x32xf32>
    %174 = vector.extract_strided_slice %17 {offsets = [32, 0], sizes = [8, 32], strides = [1, 1]} : vector<64x32xf32> to vector<8x32xf32>
    %175 = vector.extract_strided_slice %22 {offsets = [32, 0], sizes = [8, 32], strides = [1, 1]} : vector<64x32xf32> to vector<8x32xf32>
    %cst_53 = arith.constant dense<0.000000e+00> : vector<8x32xf32>
    %176 = tpu.matmul %172, %23, %cst_53 {dimension_numbers = #tpu.dot_dimension_numbers<[1], [0], [0], [1], [0, 0, 1, 1], [], []>} : vector<8x32xf32>, vector<32x32xf32>, vector<8x32xf32> -> vector<8x32xf32>
    %cst_54 = arith.constant dense<0.000000e+00> : vector<8x32xf32>
    %177 = tpu.matmul %172, %24, %cst_54 {dimension_numbers = #tpu.dot_dimension_numbers<[1], [0], [0], [1], [0, 0, 1, 1], [], []>} : vector<8x32xf32>, vector<32x32xf32>, vector<8x32xf32> -> vector<8x32xf32>
    %cst_55 = arith.constant dense<0.000000e+00> : vector<8x32xf32>
    %178 = tpu.matmul %172, %25, %cst_55 {dimension_numbers = #tpu.dot_dimension_numbers<[1], [0], [0], [1], [0, 0, 1, 1], [], []>} : vector<8x32xf32>, vector<32x32xf32>, vector<8x32xf32> -> vector<8x32xf32>
    %179 = vector.broadcast %26 : vector<1x32xf32> to vector<8x32xf32>
    %180 = arith.addf %178, %179 : vector<8x32xf32>
    %181 = arith.addf %173, %176 : vector<8x32xf32>
    %182 = arith.negf %181 : vector<8x32xf32>
    %183 = math.exp %182 : vector<8x32xf32>
    %cst_56 = arith.constant 1.000000e+00 : f32
    %184 = vector.broadcast %cst_56 : f32 to vector<8x32xf32>
    %185 = arith.addf %184, %183 : vector<8x32xf32>
    %186 = arith.divf %184, %185 : vector<8x32xf32>
    %187 = arith.addf %174, %177 : vector<8x32xf32>
    %188 = arith.negf %187 : vector<8x32xf32>
    %189 = math.exp %188 : vector<8x32xf32>
    %cst_57 = arith.constant 1.000000e+00 : f32
    %190 = vector.broadcast %cst_57 : f32 to vector<8x32xf32>
    %191 = arith.addf %190, %189 : vector<8x32xf32>
    %192 = arith.divf %190, %191 : vector<8x32xf32>
    %193 = arith.mulf %186, %180 : vector<8x32xf32>
    %194 = arith.addf %175, %193 : vector<8x32xf32>
    %195 = math.tanh %194 : vector<8x32xf32>
    %cst_58 = arith.constant 1.000000e+00 : f32
    %196 = vector.broadcast %cst_58 : f32 to vector<8x32xf32>
    %197 = arith.subf %196, %192 : vector<8x32xf32>
    %198 = arith.subf %195, %172 : vector<8x32xf32>
    %199 = arith.mulf %197, %198 : vector<8x32xf32>
    %200 = arith.addf %172, %199 : vector<8x32xf32>
    %c4_i32 = arith.constant 4 : i32
    %201 = vector.broadcast %c4_i32 : i32 to vector<8x1xi32>
    %202 = arith.cmpi sgt, %27, %201 : vector<8x1xi32>
    %203 = arith.extui %202 : vector<8x1xi1> to vector<8x1xi32>
    %204 = arith.sitofp %203 : vector<8x1xi32> to vector<8x1xf32>
    %205 = arith.subf %200, %172 : vector<8x32xf32>
    %206 = vector.broadcast %204 : vector<8x1xf32> to vector<8x32xf32>
    %207 = arith.mulf %206, %205 : vector<8x32xf32>
    %208 = arith.addf %172, %207 : vector<8x32xf32>
    %209 = vector.extract_strided_slice %12 {offsets = [40, 0], sizes = [8, 32], strides = [1, 1]} : vector<64x32xf32> to vector<8x32xf32>
    %210 = vector.extract_strided_slice %17 {offsets = [40, 0], sizes = [8, 32], strides = [1, 1]} : vector<64x32xf32> to vector<8x32xf32>
    %211 = vector.extract_strided_slice %22 {offsets = [40, 0], sizes = [8, 32], strides = [1, 1]} : vector<64x32xf32> to vector<8x32xf32>
    %cst_59 = arith.constant dense<0.000000e+00> : vector<8x32xf32>
    %212 = tpu.matmul %208, %23, %cst_59 {dimension_numbers = #tpu.dot_dimension_numbers<[1], [0], [0], [1], [0, 0, 1, 1], [], []>} : vector<8x32xf32>, vector<32x32xf32>, vector<8x32xf32> -> vector<8x32xf32>
    %cst_60 = arith.constant dense<0.000000e+00> : vector<8x32xf32>
    %213 = tpu.matmul %208, %24, %cst_60 {dimension_numbers = #tpu.dot_dimension_numbers<[1], [0], [0], [1], [0, 0, 1, 1], [], []>} : vector<8x32xf32>, vector<32x32xf32>, vector<8x32xf32> -> vector<8x32xf32>
    %cst_61 = arith.constant dense<0.000000e+00> : vector<8x32xf32>
    %214 = tpu.matmul %208, %25, %cst_61 {dimension_numbers = #tpu.dot_dimension_numbers<[1], [0], [0], [1], [0, 0, 1, 1], [], []>} : vector<8x32xf32>, vector<32x32xf32>, vector<8x32xf32> -> vector<8x32xf32>
    %215 = vector.broadcast %26 : vector<1x32xf32> to vector<8x32xf32>
    %216 = arith.addf %214, %215 : vector<8x32xf32>
    %217 = arith.addf %209, %212 : vector<8x32xf32>
    %218 = arith.negf %217 : vector<8x32xf32>
    %219 = math.exp %218 : vector<8x32xf32>
    %cst_62 = arith.constant 1.000000e+00 : f32
    %220 = vector.broadcast %cst_62 : f32 to vector<8x32xf32>
    %221 = arith.addf %220, %219 : vector<8x32xf32>
    %222 = arith.divf %220, %221 : vector<8x32xf32>
    %223 = arith.addf %210, %213 : vector<8x32xf32>
    %224 = arith.negf %223 : vector<8x32xf32>
    %225 = math.exp %224 : vector<8x32xf32>
    %cst_63 = arith.constant 1.000000e+00 : f32
    %226 = vector.broadcast %cst_63 : f32 to vector<8x32xf32>
    %227 = arith.addf %226, %225 : vector<8x32xf32>
    %228 = arith.divf %226, %227 : vector<8x32xf32>
    %229 = arith.mulf %222, %216 : vector<8x32xf32>
    %230 = arith.addf %211, %229 : vector<8x32xf32>
    %231 = math.tanh %230 : vector<8x32xf32>
    %cst_64 = arith.constant 1.000000e+00 : f32
    %232 = vector.broadcast %cst_64 : f32 to vector<8x32xf32>
    %233 = arith.subf %232, %228 : vector<8x32xf32>
    %234 = arith.subf %231, %208 : vector<8x32xf32>
    %235 = arith.mulf %233, %234 : vector<8x32xf32>
    %236 = arith.addf %208, %235 : vector<8x32xf32>
    %c5_i32 = arith.constant 5 : i32
    %237 = vector.broadcast %c5_i32 : i32 to vector<8x1xi32>
    %238 = arith.cmpi sgt, %27, %237 : vector<8x1xi32>
    %239 = arith.extui %238 : vector<8x1xi1> to vector<8x1xi32>
    %240 = arith.sitofp %239 : vector<8x1xi32> to vector<8x1xf32>
    %241 = arith.subf %236, %208 : vector<8x32xf32>
    %242 = vector.broadcast %240 : vector<8x1xf32> to vector<8x32xf32>
    %243 = arith.mulf %242, %241 : vector<8x32xf32>
    %244 = arith.addf %208, %243 : vector<8x32xf32>
    %245 = vector.extract_strided_slice %12 {offsets = [48, 0], sizes = [8, 32], strides = [1, 1]} : vector<64x32xf32> to vector<8x32xf32>
    %246 = vector.extract_strided_slice %17 {offsets = [48, 0], sizes = [8, 32], strides = [1, 1]} : vector<64x32xf32> to vector<8x32xf32>
    %247 = vector.extract_strided_slice %22 {offsets = [48, 0], sizes = [8, 32], strides = [1, 1]} : vector<64x32xf32> to vector<8x32xf32>
    %cst_65 = arith.constant dense<0.000000e+00> : vector<8x32xf32>
    %248 = tpu.matmul %244, %23, %cst_65 {dimension_numbers = #tpu.dot_dimension_numbers<[1], [0], [0], [1], [0, 0, 1, 1], [], []>} : vector<8x32xf32>, vector<32x32xf32>, vector<8x32xf32> -> vector<8x32xf32>
    %cst_66 = arith.constant dense<0.000000e+00> : vector<8x32xf32>
    %249 = tpu.matmul %244, %24, %cst_66 {dimension_numbers = #tpu.dot_dimension_numbers<[1], [0], [0], [1], [0, 0, 1, 1], [], []>} : vector<8x32xf32>, vector<32x32xf32>, vector<8x32xf32> -> vector<8x32xf32>
    %cst_67 = arith.constant dense<0.000000e+00> : vector<8x32xf32>
    %250 = tpu.matmul %244, %25, %cst_67 {dimension_numbers = #tpu.dot_dimension_numbers<[1], [0], [0], [1], [0, 0, 1, 1], [], []>} : vector<8x32xf32>, vector<32x32xf32>, vector<8x32xf32> -> vector<8x32xf32>
    %251 = vector.broadcast %26 : vector<1x32xf32> to vector<8x32xf32>
    %252 = arith.addf %250, %251 : vector<8x32xf32>
    %253 = arith.addf %245, %248 : vector<8x32xf32>
    %254 = arith.negf %253 : vector<8x32xf32>
    %255 = math.exp %254 : vector<8x32xf32>
    %cst_68 = arith.constant 1.000000e+00 : f32
    %256 = vector.broadcast %cst_68 : f32 to vector<8x32xf32>
    %257 = arith.addf %256, %255 : vector<8x32xf32>
    %258 = arith.divf %256, %257 : vector<8x32xf32>
    %259 = arith.addf %246, %249 : vector<8x32xf32>
    %260 = arith.negf %259 : vector<8x32xf32>
    %261 = math.exp %260 : vector<8x32xf32>
    %cst_69 = arith.constant 1.000000e+00 : f32
    %262 = vector.broadcast %cst_69 : f32 to vector<8x32xf32>
    %263 = arith.addf %262, %261 : vector<8x32xf32>
    %264 = arith.divf %262, %263 : vector<8x32xf32>
    %265 = arith.mulf %258, %252 : vector<8x32xf32>
    %266 = arith.addf %247, %265 : vector<8x32xf32>
    %267 = math.tanh %266 : vector<8x32xf32>
    %cst_70 = arith.constant 1.000000e+00 : f32
    %268 = vector.broadcast %cst_70 : f32 to vector<8x32xf32>
    %269 = arith.subf %268, %264 : vector<8x32xf32>
    %270 = arith.subf %267, %244 : vector<8x32xf32>
    %271 = arith.mulf %269, %270 : vector<8x32xf32>
    %272 = arith.addf %244, %271 : vector<8x32xf32>
    %c6_i32 = arith.constant 6 : i32
    %273 = vector.broadcast %c6_i32 : i32 to vector<8x1xi32>
    %274 = arith.cmpi sgt, %27, %273 : vector<8x1xi32>
    %275 = arith.extui %274 : vector<8x1xi1> to vector<8x1xi32>
    %276 = arith.sitofp %275 : vector<8x1xi32> to vector<8x1xf32>
    %277 = arith.subf %272, %244 : vector<8x32xf32>
    %278 = vector.broadcast %276 : vector<8x1xf32> to vector<8x32xf32>
    %279 = arith.mulf %278, %277 : vector<8x32xf32>
    %280 = arith.addf %244, %279 : vector<8x32xf32>
    %281 = vector.extract_strided_slice %12 {offsets = [56, 0], sizes = [8, 32], strides = [1, 1]} : vector<64x32xf32> to vector<8x32xf32>
    %282 = vector.extract_strided_slice %17 {offsets = [56, 0], sizes = [8, 32], strides = [1, 1]} : vector<64x32xf32> to vector<8x32xf32>
    %283 = vector.extract_strided_slice %22 {offsets = [56, 0], sizes = [8, 32], strides = [1, 1]} : vector<64x32xf32> to vector<8x32xf32>
    %cst_71 = arith.constant dense<0.000000e+00> : vector<8x32xf32>
    %284 = tpu.matmul %280, %23, %cst_71 {dimension_numbers = #tpu.dot_dimension_numbers<[1], [0], [0], [1], [0, 0, 1, 1], [], []>} : vector<8x32xf32>, vector<32x32xf32>, vector<8x32xf32> -> vector<8x32xf32>
    %cst_72 = arith.constant dense<0.000000e+00> : vector<8x32xf32>
    %285 = tpu.matmul %280, %24, %cst_72 {dimension_numbers = #tpu.dot_dimension_numbers<[1], [0], [0], [1], [0, 0, 1, 1], [], []>} : vector<8x32xf32>, vector<32x32xf32>, vector<8x32xf32> -> vector<8x32xf32>
    %cst_73 = arith.constant dense<0.000000e+00> : vector<8x32xf32>
    %286 = tpu.matmul %280, %25, %cst_73 {dimension_numbers = #tpu.dot_dimension_numbers<[1], [0], [0], [1], [0, 0, 1, 1], [], []>} : vector<8x32xf32>, vector<32x32xf32>, vector<8x32xf32> -> vector<8x32xf32>
    %287 = vector.broadcast %26 : vector<1x32xf32> to vector<8x32xf32>
    %288 = arith.addf %286, %287 : vector<8x32xf32>
    %289 = arith.addf %281, %284 : vector<8x32xf32>
    %290 = arith.negf %289 : vector<8x32xf32>
    %291 = math.exp %290 : vector<8x32xf32>
    %cst_74 = arith.constant 1.000000e+00 : f32
    %292 = vector.broadcast %cst_74 : f32 to vector<8x32xf32>
    %293 = arith.addf %292, %291 : vector<8x32xf32>
    %294 = arith.divf %292, %293 : vector<8x32xf32>
    %295 = arith.addf %282, %285 : vector<8x32xf32>
    %296 = arith.negf %295 : vector<8x32xf32>
    %297 = math.exp %296 : vector<8x32xf32>
    %cst_75 = arith.constant 1.000000e+00 : f32
    %298 = vector.broadcast %cst_75 : f32 to vector<8x32xf32>
    %299 = arith.addf %298, %297 : vector<8x32xf32>
    %300 = arith.divf %298, %299 : vector<8x32xf32>
    %301 = arith.mulf %294, %288 : vector<8x32xf32>
    %302 = arith.addf %283, %301 : vector<8x32xf32>
    %303 = math.tanh %302 : vector<8x32xf32>
    %cst_76 = arith.constant 1.000000e+00 : f32
    %304 = vector.broadcast %cst_76 : f32 to vector<8x32xf32>
    %305 = arith.subf %304, %300 : vector<8x32xf32>
    %306 = arith.subf %303, %280 : vector<8x32xf32>
    %307 = arith.mulf %305, %306 : vector<8x32xf32>
    %308 = arith.addf %280, %307 : vector<8x32xf32>
    %c7_i32 = arith.constant 7 : i32
    %309 = vector.broadcast %c7_i32 : i32 to vector<8x1xi32>
    %310 = arith.cmpi sgt, %27, %309 : vector<8x1xi32>
    %311 = arith.extui %310 : vector<8x1xi1> to vector<8x1xi32>
    %312 = arith.sitofp %311 : vector<8x1xi32> to vector<8x1xf32>
    %313 = arith.subf %308, %280 : vector<8x32xf32>
    %314 = vector.broadcast %312 : vector<8x1xf32> to vector<8x32xf32>
    %315 = arith.mulf %314, %313 : vector<8x32xf32>
    %316 = arith.addf %280, %315 : vector<8x32xf32>
    %c0_77 = arith.constant 0 : index
    %c0_78 = arith.constant 0 : index
    %317 = vector.load %arg13[%c0_77, %c0_78] : memref<32x128xf32, #tpu.memory_space<vmem>>, vector<32x128xf32>
    %cst_79 = arith.constant dense<0.000000e+00> : vector<8x128xf32>
    %318 = tpu.matmul %316, %317, %cst_79 {dimension_numbers = #tpu.dot_dimension_numbers<[1], [0], [0], [1], [0, 0, 1, 1], [], []>} : vector<8x32xf32>, vector<32x128xf32>, vector<8x128xf32> -> vector<8x128xf32>
    %c0_80 = arith.constant 0 : index
    %c0_81 = arith.constant 0 : index
    %319 = vector.load %arg14[%c0_80, %c0_81] : memref<1x128xf32, #tpu.memory_space<vmem>>, vector<1x128xf32>
    %320 = vector.broadcast %319 : vector<1x128xf32> to vector<8x128xf32>
    %321 = arith.addf %318, %320 : vector<8x128xf32>
    %c0_82 = arith.constant 0 : index
    %c0_83 = arith.constant 0 : index
    %322 = vector.load %arg15[%c0_82, %c0_83] : memref<8x128xf32, #tpu.memory_space<vmem>>, vector<8x128xf32>
    tpu.vector_store %arg15[%c0_82, %c0_83], %321 {strides = array<i32>} : memref<8x128xf32, #tpu.memory_space<vmem>>, vector<8x128xf32>,
    return
  }
}

</mosaic_0001>

<bundles_post_ra>
// kernel: tpu_custom_call.1
= control target key start
LH: loop header
LB: loop body
LE: loop exit
PB: predicated region body
PF: predicated region fallthrough
CT: control target
= control target key end

     0   :  { %20 = vsyncpa [#allocation3], 0  ;;  %s4201_s0 = inlined_call_operand.vmem [shape: s32[64,1], index: 0, kind: input, shape index: {}]   ;;  %s4202_s1 = inlined_call_operand.vmem [shape: s32[8,1], index: 1, kind: input, shape index: {}]   ;;  %s4203_s2 = inlined_call_operand.vmem [shape: f32[50,16], index: 2, kind: input, shape index: {}]   ;;  %s4204_s3 = inlined_call_operand.vmem [shape: f32[16,32], index: 3, kind: input, shape index: {}]   ;;  %s4205_s4 = inlined_call_operand.hbm [shape: f32[16,32], index: 4, kind: input, shape index: {}]   ;;  %s4206_s5 = inlined_call_operand.hbm [shape: f32[16,32], index: 5, kind: input, shape index: {}]   ;;  %s4207_s6 = inlined_call_operand.vmem [shape: f32[32,32], index: 6, kind: input, shape index: {}]   ;;  %s4208_s7 = inlined_call_operand.vmem [shape: f32[32,32], index: 7, kind: input, shape index: {}]   ;;  %s4209_s8 = inlined_call_operand.vmem [shape: f32[32,32], index: 8, kind: input, shape index: {}]   ;;  %s4210_s9 = inlined_call_operand.vmem [shape: f32[1,32], index: 9, kind: input, shape index: {}]   ;;  %s4211_s10 = inlined_call_operand.vmem [shape: f32[1,32], index: 10, kind: input, shape index: {}]   ;;  %s4212_s11 = inlined_call_operand.vmem [shape: f32[1,32], index: 11, kind: input, shape index: {}]   ;;  %s4213_s12 = inlined_call_operand.vmem [shape: f32[1,32], index: 12, kind: input, shape index: {}]   ;;  %s4214_s13 = inlined_call_operand.vmem [shape: f32[32,128], index: 13, kind: input, shape index: {}]   ;;  %s4215_s14 = inlined_call_operand.vmem [shape: f32[1,128], index: 14, kind: input, shape index: {}]   ;;  %s4216_s15 = inlined_call_operand.hbm [shape: f32[8,128], index: 15, kind: output, shape index: {}]  }
   0x1   :  { %21 = vsyncpa [#allocation6], 0 }
   0x2   :  { %22 = vsyncpa [#allocation4], 0  ;;  %s3496_s18 = smov [#allocation2]  }
   0x3   :  { %s36_s19 = sshll.u32 %s3496_s18, 4  ;;  %s37_s19 = int_to_ptr.vmem [resolvable:$true] %s36_s19 }
   0x4   :  { %s3438_s20 = scalar_lea.vmem %s37_s19, 256  ;;  %p3443_p1 = scmp.lt.s32.totalorder %s37_s19, %s37_s19 }
   0x5   :  { %p3439_p0 = scmp.ne.s32.totalorder %s37_s19, %s3438_s20  ;;  %p3444_p2 = scmp.lt.s32.totalorder %s3438_s20, %s3438_s20 }
   0x7   :  { %p3445_p3 = por %p3444_p2, %p3443_p1 }
   0x9   :  { %p3446_p4 = pnand %p3445_p3, %p3439_p0 }
   0xb   :  { %3449 = shalt.err (!%p3446_p4)
}
   0xc   :  { %s3497_s21 = smov 128   ;;  %s3498_s22 = smov 8  }
   0xd   :  { %42 = dma.hbm_to_vmem [thread:$0]  %s4205_s4, 256, %s37_s19, [#allocation3], %s3497_s21, %s3497_s21, %s3498_s22  }
   0xe   :  { %s3499_s25 = smov [#allocation5]  }
   0xf   :  { %s48_s26 = sshll.u32 %s3499_s25, 4  ;;  %s49_s26 = int_to_ptr.vmem [resolvable:$true] %s48_s26 }
  0x10   :  { %s3458_s27 = scalar_lea.vmem %s49_s26, 256  ;;  %p3463_p6 = scmp.lt.s32.totalorder %s49_s26, %s49_s26 }
  0x11   :  { %p3459_p5 = scmp.ne.s32.totalorder %s49_s26, %s3458_s27  ;;  %p3464_p7 = scmp.lt.s32.totalorder %s3458_s27, %s3458_s27 }
  0x13   :  { %p3465_p8 = por %p3464_p7, %p3463_p6 }
  0x15   :  { %p3466_p9 = pnand %p3465_p8, %p3459_p5 }
  0x17   :  { %3469 = shalt.err (!%p3466_p9)
}
  0x18   :  { %54 = dma.hbm_to_vmem [thread:$0]  %s4206_s5, 256, %s49_s26, [#allocation6], %s3497_s21, %s3497_s21, %s3498_s22  }
  0x19   :  { %3490 = dma.done.wait [#allocation3], 256  }
  0x1a   :  { %3491 = vsyncadd [#allocation3], 4294967040 }
  0x1b   :  { %3492 = dma.done.wait [#allocation6], 256  }
  0x1c   :  { %3493 = vsyncadd [#allocation6], 4294967040  ;;  %v3500_v0 = vmov 0   ;;  %v81_v1 = vld [vmem:[%s4201_s0 + $0x10] sm:$0xff]  ;;  %v79_v2 = vld [vmem:[%s4201_s0] sm:$0xff]  ;;  %vm169_vm0 = vcmask 1041408   ;;  %v87_v27 = vlaneseq }
  0x1d   :  { %3345 = vset.pattern.permute.xlu1 %v3500_v0  ;;  %3344 = vset.pattern.permute.xlu0 %v3500_v0  ;;  %v82_v3 = vld [vmem:[%s4201_s0 + $0x18] sm:$0xff]  ;;  %v80_v4 = vld [vmem:[%s4201_s0 + $0x8] sm:$0xff]  ;;  %v143_v5 = vld [vmem:[%s4203_s2 + $0x30] sm:$0x3]  ;;  %v3501_v15 = vmov 0.0   ;;  %vm144_vm9 = vcmask 408576  }
  0x1e   :  { %96 = vperm.xlu1 %3345, %v81_v1   ;;  %90 = vperm.xlu0 %3344, %v79_v2   ;;  %v142_v6 = vld [vmem:[%s4203_s2 + $0x28] sm:$0xff]  ;;  %v83_v8 = vld [vmem:[%s4201_s0 + $0x20] sm:$0xff]  ;;  %v140_v11 = vld [vmem:[%s4203_s2 + $0x18] sm:$0xff]  ;;  %v88_v28 = vand.u32 127, %v87_v27  ;;  %s3503_s28 = smov [#allocation7]  }
  0x1f   :  { %2987 = vmatprep.subr.msk.mxu0 %vm169_vm0, %v143_v5  ;;  %v84_v7 = vld [vmem:[%s4201_s0 + $0x28] sm:$0xff]  ;;  %v141_v9 = vld [vmem:[%s4203_s2 + $0x20] sm:$0xff]  ;;  %v86_v12 = vld [vmem:[%s4201_s0 + $0x38] sm:$0xff]  ;;  %s2715_s29 = sshll.u32 %s3503_s28, 4  ;;  %s2716_s29 = int_to_ptr.vmem [resolvable:$true] %s2715_s29 }
  0x20   :  { %2988 = vmatpush3.msk.msra.mxu0 %vm169_vm0, %v143_v5  ;;  %v658_v10 = vld [vmem:[%s4202_s1] sm:$0xff]  ;;  %v85_v13 = vld [vmem:[%s4201_s0 + $0x30] sm:$0xff]  ;;  %v138_v18 = vld [vmem:[%s4203_s2 + $0x8] sm:$0xff]  ;;  %s3470_s4 = scalar_lea.vmem %s2716_s29, 128  ;;  %p3475_p11 = scmp.lt.s32.totalorder %s2716_s29, %s2716_s29 }
  0x21   :  { %2989 = vmatprep.subr.mxu0 %v142_v6  ;;  %vm1143_vm1 = vcmp.gt.s32.totalorder %v658_v10, 1  ;;  %vm899_vm2 = vcmp.gt.s32.totalorder %v658_v10, 0  ;;  %v139_v14 = vld [vmem:[%s4203_s2 + $0x10] sm:$0xff]  ;;  %vm1633_vm3 = vcmp.gt.s32.totalorder %v658_v10, 3  ;;  %vm1388_vm4 = vcmp.gt.s32.totalorder %v658_v10, 2  ;;  %v137_v19 = vld [vmem:[%s4203_s2] sm:$0xff]  ;;  %p3471_p10 = scmp.ne.s32.totalorder %s2716_s29, %s3470_s4  ;;  %p3476_p12 = scmp.lt.s32.totalorder %s3470_s4, %s3470_s4 }
  0x22   :  { %99 = vperm.xlu1 %3345, %v82_v3   ;;  %93 = vperm.xlu0 %3344, %v80_v4   ;;  %v2778_v16 = vsel %vm1143_vm1, 1.0, %v3501_v15  ;;  %v2772_v17 = vsel %vm899_vm2, 1.0, %v3501_v15  ;;  %v2790_v20 = vsel %vm1633_vm3, 1.0, %v3501_v15  ;;  %v2784_v21 = vsel %vm1388_vm4, 1.0, %v3501_v15  ;;  %v279_v24 = vld [vmem:[%s4204_s3 + $0x8] sm:$0xff]  ;;  %v532_v45 = vld [vmem:[#allocation5 + $0x8] sm:$0xff] }
  0x23   :  { %2990 = vmatpush3.msra.mxu0 %v142_v6  ;;  %vm2123_vm5 = vcmp.gt.s32.totalorder %v658_v10, 5  ;;  %vm1878_vm6 = vcmp.gt.s32.totalorder %v658_v10, 4  ;;  %vm2613_vm7 = vcmp.gt.s32.totalorder %v658_v10, 7  ;;  %vm2368_vm8 = vcmp.gt.s32.totalorder %v658_v10, 6  ;;  %3013 = vmatprep.subr.mxu1 %v279_v24  ;;  %v278_v46 = vld [vmem:[%s4204_s3] sm:$0xff]  ;;  %v531_v47 = vld [vmem:[#allocation5] sm:$0xff]  ;;  %p3477_p13 = por %p3476_p12, %p3475_p11 }
  0x24   :  { %2991 = vmatprep.subr.mxu0 %v141_v9  ;;  %v2802_v22 = vsel %vm2123_vm5, 1.0, %v3501_v15  ;;  %v2796_v23 = vsel %vm1878_vm6, 1.0, %v3501_v15  ;;  %v2814_v25 = vsel %vm2613_vm7, 1.0, %v3501_v15  ;;  %v2808_v26 = vsel %vm2368_vm8, 1.0, %v3501_v15  ;;  %3014 = vmatpush3.msra.mxu1 %v279_v24  ;;  %v418_v48 = vld [vmem:[#allocation2 + $0x8] sm:$0xff]  ;;  %v3672_v51 = vld [vmem:[%s4209_s8 + $0x18] sm:$0xff] }
  0x25   :  { %2992 = vmatpush3.msra.mxu0 %v141_v9  ;;  %3015 = vmatprep.subr.mxu1 %v278_v46  ;;  %vm287_vm2 = vcmask 130048   ;;  %v417_v52 = vld [vmem:[#allocation2] sm:$0xff]  ;;  %v3683_v55 = vld [vmem:[%s4209_s8 + $0x10] sm:$0xff]  ;;  %v3695_v58 = vld [vmem:[%s4209_s8 + $0x8] sm:$0xff]  ;;  %vm3502_vm3 = vmmov 0   ;;  %vm659_vm4 = vcmask 261120   ;;  %p3478_p0 = pnand %p3477_p13, %p3471_p10 }
  0x26   :  { %105 = vperm.xlu1 %3345, %v84_v7   ;;  %102 = vperm.xlu0 %3344, %v83_v8   ;;  %v3706_v61 = vld [vmem:[%s4209_s8] sm:$0xff]  ;;  %v3717_v62 = vld [vmem:[%s4207_s6 + $0x18] sm:$0xff]  ;;  %v3726_v63 = vld [vmem:[%s4207_s6 + $0x10] sm:$0xff] }
  0x27   :  { %2993 = vmatprep.subr.mxu0 %v140_v11  ;;  %3016 = vmatpush3.msra.mxu1 %v278_v46  ;;  %v3734_v0 = vld [vmem:[%s4208_s7 + $0x18] sm:$0xff]  ;;  %v3740_v1 = vld [vmem:[%s4207_s6 + $0x8] sm:$0xff]  ;;  %v3750_v2 = vld [vmem:[%s4207_s6] sm:$0xff] }
  0x28   :  { %2994 = vmatpush3.msra.mxu0 %v140_v11  ;;  %3029 = vmatprep.subr.mxu1 %v418_v48  ;;  %v3757_v3 = vld [vmem:[%s4208_s7 + $0x10] sm:$0xff]  ;;  %v3768_v4 = vld [vmem:[%s4208_s7 + $0x8] sm:$0xff]  ;;  %v3775_v5 = vld [vmem:[%s4208_s7] sm:$0xff] }
  0x29   :  { %2995 = vmatprep.subr.mxu0 %v139_v14  ;;  %v2742_v6 = vld [vmem:[%s4210_s9] ss:$0 sm:$0xff] }
  0x2a   :  { %111 = vperm.xlu1 %3345, %v86_v12   ;;  %108 = vperm.xlu0 %3344, %v85_v13   ;;  %v3813_v7 = vld [vmem:[%s4212_s11] ss:$0 sm:$0xff] }
  0x2b   :  { %2996 = vmatpush3.msra.mxu0 %v139_v14 }
  0x2c   :  { %2997 = vmatprep.subr.mxu0 %v138_v18 }
  0x2d   :  { %2998 = vmatpush3.msra.mxu0 %v138_v18 }
  0x2e   :  { %1149 = vperm.xlu1 %3345, %v2778_v16   ;;  %904 = vperm.xlu0 %3344, %v2772_v17  }
  0x2f   :  { %2999 = vmatprep.subr.mxu0 %v137_v19 }
  0x30   :  { %3000 = vmatpush3.msra.mxu0 %v137_v19 }
  0x31   :  { %3045 = vmatprep.subr.mxu0 %v532_v45 }
  0x32   :  { %1639 = vperm.xlu1 %3345, %v2790_v20   ;;  %1394 = vperm.xlu0 %3344, %v2784_v21  }
  0x36   :  { %2129 = vperm.xlu1 %3345, %v2802_v22   ;;  %1884 = vperm.xlu0 %3344, %v2796_v23  }
  0x3a   :  { %2619 = vperm.xlu1 %3345, %v2814_v25   ;;  %2374 = vperm.xlu0 %3344, %v2808_v26  }
  0x99   :  { %v97_v29 = vpop.permute.xlu1 %96  ;;  %v91_v30 = vpop.permute.xlu0 %90 }
  0x9a   :  { %vm113_vm10 = vcmp.eq.s32.totalorder %v91_v30, %v88_v28  ;;  %vm115_vm11 = vcmp.eq.s32.totalorder %v97_v29, %v88_v28 }
  0x9b   :  { %v2725_v31 = vsel %vm113_vm10, 1.0, %v3501_v15  ;;  %v2727_v34 = vsel %vm115_vm11, 1.0, %v3501_v15 }
  0x9c   :  { %3001 = vmatprep.mubr.msk.f32.mxu0 %vm144_vm9, %v2725_v31 }
  0x9d   :  { %v100_v32 = vpop.permute.xlu1 %99  ;;  %v94_v33 = vpop.permute.xlu0 %93 }
  0x9e   :  { %vm114_vm12 = vcmp.eq.s32.totalorder %v94_v33, %v88_v28  ;;  %vm116_vm13 = vcmp.eq.s32.totalorder %v100_v32, %v88_v28 }
  0x9f   :  { %v2726_v35 = vsel %vm114_vm12, 1.0, %v3501_v15  ;;  %v2728_v38 = vsel %vm116_vm13, 1.0, %v3501_v15 }
  0xa0   :  { %3002 = vmatmul.mubr.msk.f32.vlgmr.msra.gmra.mxu0 %vm144_vm9, %v2726_v35 }
  0xa1   :  { %v106_v36 = vpop.permute.xlu1 %105  ;;  %3004 = vmatprep.mubr.msk.f32.mxu0 %vm144_vm9, %v2727_v34  ;;  %v103_v37 = vpop.permute.xlu0 %102  ;;  %3046 = vmatpush3.msra.mxu0 %v532_v45 }
  0xa2   :  { %vm117_vm14 = vcmp.eq.s32.totalorder %v103_v37, %v88_v28  ;;  %vm118_vm15 = vcmp.eq.s32.totalorder %v106_v36, %v88_v28  ;;  %3047 = vmatprep.subr.mxu0 %v531_v47  ;;  %v2751_v37 = vld [vmem:[%s4211_s10] ss:$0 sm:$0xff] }
  0xa3   :  { %v2729_v39 = vsel %vm117_vm14, 1.0, %v3501_v15  ;;  %v2730_v42 = vsel %vm118_vm15, 1.0, %v3501_v15  ;;  %3048 = vmatpush3.msra.mxu0 %v531_v47 }
  0xa4   :  { %3005 = vmatmul.mubr.msk.f32.gmra.mxu0 %vm144_vm9, %v2728_v38  ;;  %3083 = vmatprep.subr.mxu0 %v3501_v15 }
  0xa5   :  { %v112_v40 = vpop.permute.xlu1 %111  ;;  %3007 = vmatprep.mubr.msk.f32.mxu0 %vm144_vm9, %v2729_v39  ;;  %v109_v41 = vpop.permute.xlu0 %108 }
  0xa6   :  { %vm119_vm0 = vcmp.eq.s32.totalorder %v109_v41, %v88_v28  ;;  %vm120_vm1 = vcmp.eq.s32.totalorder %v112_v40, %v88_v28 }
  0xa7   :  { %v2731_v43 = vsel %vm119_vm0, 1.0, %v3501_v15  ;;  %v2732_v44 = vsel %vm120_vm1, 1.0, %v3501_v15 }
  0xa8   :  { %3008 = vmatmul.mubr.msk.f32.gmra.mxu0 %vm144_vm9, %v2730_v42 }
  0xa9   :  { %3010 = vmatprep.mubr.msk.f32.mxu0 %vm144_vm9, %v2731_v43 }
  0xac   :  { %3011 = vmatmul.mubr.msk.f32.gmra.mxu0 %vm144_vm9, %v2732_v44 }
 0x160   :  { %v3003_v49 = vpop.f32.mrf.mxu0 }
 0x162   :  { %v239_v50 = vpop.f32.mrf.mxu0 }
 0x163   :  { %3017 = vmatprep.mubr.msk.f32.mxu1 %vm287_vm2, %v239_v50  ;;  %3049 = vmatprep.mubr.msk.f32.mxu0 %vm287_vm2, %v239_v50 }
 0x164   :  { %v3006_v53 = vpop.f32.mrf.mxu0  ;;  %3018 = vmatmul.mubr.msk.f32.vlgmr.msra.gmra.mxu1 %vm287_vm2, %v3003_v49  ;;  %3050 = vmatmul.mubr.msk.f32.vlgmr.msra.gmra.mxu0 %vm287_vm2, %v3003_v49 }
 0x165   :  { %3030 = vmatpush3.msra.mxu1 %v418_v48  ;;  %3084 = vmatpush3.msra.mxu0 %v3672_v51 }
 0x166   :  { %v249_v54 = vpop.f32.mrf.mxu0  ;;  %3031 = vmatprep.subr.mxu1 %v417_v52  ;;  %3085 = vmatprep.subr.mxu0 %v3501_v15 }
 0x167   :  { %3020 = vmatprep.mubr.msk.f32.mxu1 %vm287_vm2, %v249_v54  ;;  %3052 = vmatprep.mubr.msk.f32.mxu0 %vm287_vm2, %v249_v54 }
 0x168   :  { %v3009_v56 = vpop.f32.mrf.mxu0  ;;  %3021 = vmatmul.mubr.msk.f32.gmra.mxu1 %vm287_vm2, %v3006_v53  ;;  %3053 = vmatmul.mubr.msk.f32.gmra.mxu0 %vm287_vm2, %v3006_v53 }
 0x169   :  { %3032 = vmatpush3.msra.mxu1 %v417_v52  ;;  %3086 = vmatpush3.msra.mxu0 %v3683_v55 }
 0x16a   :  { %v259_v57 = vpop.f32.mrf.mxu0  ;;  %3061 = vmatprep.subr.mxu1 %v3501_v15  ;;  %3087 = vmatprep.subr.mxu0 %v3501_v15 }
 0x16b   :  { %3023 = vmatprep.mubr.msk.f32.mxu1 %vm287_vm2, %v259_v57  ;;  %3055 = vmatprep.mubr.msk.f32.mxu0 %vm287_vm2, %v259_v57 }
 0x16c   :  { %v3012_v59 = vpop.f32.mrf.mxu0  ;;  %3024 = vmatmul.mubr.msk.f32.gmra.mxu1 %vm287_vm2, %v3009_v56  ;;  %3056 = vmatmul.mubr.msk.f32.gmra.mxu0 %vm287_vm2, %v3009_v56 }
 0x16d   :  { %3088 = vmatpush3.msra.mxu0 %v3695_v58 }
 0x16e   :  { %v269_v60 = vpop.f32.mrf.mxu0  ;;  %3089 = vmatprep.subr.mxu0 %v3501_v15 }
 0x16f   :  { %3026 = vmatprep.mubr.msk.f32.mxu1 %vm287_vm2, %v269_v60  ;;  %3058 = vmatprep.mubr.msk.f32.mxu0 %vm287_vm2, %v269_v60 }
 0x170   :  { %3027 = vmatmul.mubr.msk.f32.gmra.mxu1 %vm287_vm2, %v3012_v59  ;;  %3059 = vmatmul.mubr.msk.f32.gmra.mxu0 %vm287_vm2, %v3012_v59 }
 0x171   :  { %3033 = vmatprep.mubr.msk.f32.mxu1 %vm287_vm2, %v239_v50  ;;  %3090 = vmatpush3.msra.mxu0 %v3706_v61 }
 0x172   :  { %3091 = vmatprep.mubr.msk.f32.mxu0 %vm3502_vm3, %v3501_v15  ;;  %3105 = vmatprep.subr.mxu0 %v3501_v15 }
 0x174   :  { %3034 = vmatmul.mubr.msk.f32.vlgmr.msra.gmra.mxu1 %vm287_vm2, %v3003_v49  ;;  %3092 = vmatmul.mubr.f32.vlgmr.msra.gmra.mxu0 %v3501_v15 }
 0x175   :  { %3062 = vmatpush3.msra.mxu1 %v3717_v62  ;;  %3036 = vmatprep.mubr.msk.f32.mxu1 %vm287_vm2, %v249_v54 }
 0x176   :  { %3063 = vmatprep.subr.mxu1 %v3501_v15  ;;  %3106 = vmatpush3.msra.mxu0 %v3734_v0 }
 0x177   :  { %3064 = vmatpush3.msra.mxu1 %v3726_v63  ;;  %3107 = vmatprep.subr.mxu0 %v3501_v15 }
 0x178   :  { %3037 = vmatmul.mubr.msk.f32.gmra.mxu1 %vm287_vm2, %v3006_v53  ;;  %3065 = vmatprep.subr.mxu1 %v3501_v15 }
 0x179   :  { %3039 = vmatprep.mubr.msk.f32.mxu1 %vm287_vm2, %v259_v57  ;;  %3066 = vmatpush3.msra.mxu1 %v3740_v1 }
 0x17a   :  { %3067 = vmatprep.subr.mxu1 %v3501_v15  ;;  %3108 = vmatpush3.msra.mxu0 %v3757_v3 }
 0x17b   :  { %3068 = vmatpush3.msra.mxu1 %v3750_v2  ;;  %3109 = vmatprep.subr.mxu0 %v3501_v15 }
 0x17c   :  { %3040 = vmatmul.mubr.msk.f32.gmra.mxu1 %vm287_vm2, %v3009_v56  ;;  %3072 = vmatprep.subr.mxu1 %v3501_v15 }
 0x17d   :  { %3042 = vmatprep.mubr.msk.f32.mxu1 %vm287_vm2, %v269_v60  ;;  %3110 = vmatpush3.msra.mxu0 %v3768_v4 }
 0x17e   :  { %3111 = vmatprep.subr.mxu0 %v3501_v15  ;;  %3113 = vmatprep.mubr.msk.f32.mxu0 %vm3502_vm3, %v3501_v15 }
 0x17f   :  { %3112 = vmatpush3.msra.mxu0 %v3775_v5 }
 0x180   :  { %3043 = vmatmul.mubr.msk.f32.gmra.mxu1 %vm287_vm2, %v3012_v59  ;;  %3127 = vmatprep.subr.mxu0 %v3501_v15 }
 0x181   :  { %3069 = vmatprep.mubr.msk.f32.mxu1 %vm3502_vm3, %v3501_v15 }
 0x184   :  { %3070 = vmatmul.mubr.f32.vlgmr.msra.gmra.mxu1 %v3501_v15 }
 0x185   :  { %3073 = vmatpush3.msra.mxu1 %v3734_v0  ;;  %3080 = vmatprep.mubr.msk.f32.mxu1 %vm3502_vm3, %v3501_v15 }
 0x186   :  { %3074 = vmatprep.subr.mxu1 %v3501_v15 }
 0x187   :  { %3075 = vmatpush3.msra.mxu1 %v3757_v3 }
 0x188   :  { %3076 = vmatprep.subr.mxu1 %v3501_v15 }
 0x189   :  { %3077 = vmatpush3.msra.mxu1 %v3768_v4 }
 0x18a   :  { %3078 = vmatprep.subr.mxu1 %v3501_v15 }
 0x18b   :  { %3079 = vmatpush3.msra.mxu1 %v3775_v5 }
 0x18c   :  { %3081 = vmatmul.mubr.f32.vlgmr.msra.gmra.mxu1 %v3501_v15  ;;  %3094 = vmatprep.subr.mxu1 %v3501_v15 }
 0x18d   :  { %3095 = vmatpush3.msra.mxu1 %v3717_v62  ;;  %3102 = vmatprep.mubr.msk.f32.mxu1 %vm3502_vm3, %v3501_v15 }
 0x18e   :  { %3096 = vmatprep.subr.mxu1 %v3501_v15 }
 0x18f   :  { %3097 = vmatpush3.msra.mxu1 %v3726_v63 }
 0x190   :  { %3098 = vmatprep.subr.mxu1 %v3501_v15 }
 0x191   :  { %3099 = vmatpush3.msra.mxu1 %v3740_v1 }
 0x192   :  { %3100 = vmatprep.subr.mxu1 %v3501_v15 }
 0x193   :  { %3101 = vmatpush3.msra.mxu1 %v3750_v2 }
 0x194   :  { %3116 = vmatprep.subr.mxu1 %v3501_v15 }
 0x224   :  { %v3019_v8 = vpop.f32.mrf.mxu1  ;;  %v3051_v9 = vpop.f32.mrf.mxu0 }
 0x225   :  { %v3815_v10 = vadd.f32 %v3019_v8, %v2742_v6  ;;  %v3818_v11 = vadd.f32 %v3051_v9, %v3813_v7 }
 0x226   :  { %v378_v12 = vpop.f32.mrf.mxu1  ;;  %v3820_v13 = vpop.f32.mrf.mxu0 }
 0x227   :  { %v379_v59 = vadd.f32 %v2742_v6, %v378_v12 }
 0x228   :  { %v3022_v14 = vpop.f32.mrf.mxu1  ;;  %v3054_v16 = vpop.f32.mrf.mxu0 }
 0x229   :  { %v3822_v17 = vadd.f32 %v3022_v14, %v2742_v6  ;;  %v3825_v18 = vadd.f32 %v3054_v16, %v3813_v7 }
 0x22a   :  { %v388_v19 = vpop.f32.mrf.mxu1  ;;  %v616_v20 = vpop.f32.mrf.mxu0 }
 0x22b   :  { %v3827_v21 = vadd.f32 %v2742_v6, %v388_v19  ;;  %v3830_v22 = vadd.f32 %v3813_v7, %v616_v20 }
 0x22c   :  { %v3025_v23 = vpop.f32.mrf.mxu1  ;;  %v3057_v24 = vpop.f32.mrf.mxu0 }
 0x22d   :  { %v3832_v25 = vadd.f32 %v3025_v23, %v2742_v6  ;;  %v3835_v26 = vadd.f32 %v3057_v24, %v3813_v7 }
 0x22e   :  { %v398_v27 = vpop.f32.mrf.mxu1  ;;  %v626_v28 = vpop.f32.mrf.mxu0 }
 0x22f   :  { %v3837_v29 = vadd.f32 %v2742_v6, %v398_v27  ;;  %v3840_v30 = vadd.f32 %v3813_v7, %v626_v28 }
 0x230   :  { %v3028_v31 = vpop.f32.mrf.mxu1  ;;  %v3060_v32 = vpop.f32.mrf.mxu0 }
 0x231   :  { %v3842_v33 = vadd.f32 %v3028_v31, %v2742_v6  ;;  %v3845_v34 = vadd.f32 %v3060_v32, %v3813_v7 }
 0x232   :  { %v408_v35 = vpop.f32.mrf.mxu1  ;;  %v636_v36 = vpop.f32.mrf.mxu0 }
 0x233   :  { %v3850_v38 = vadd.f32 %v2742_v6, %v408_v35  ;;  %v3853_v39 = vadd.f32 %v3813_v7, %v636_v36  ;;  %v3872_v6 = vld [vmem:[%s4213_s12] ss:$0 sm:$0xff] }
 0x234   :  { %v3035_v40 = vpop.f32.mrf.mxu1  ;;  %v875_v41 = vpop.f32.mrf.mxu0 }
 0x235   :  { %v3855_v42 = vadd.f32 %v3035_v40, %v2751_v37  ;;  %v876_v35 = vadd.f32 %v3872_v6, %v875_v41 }
 0x236   :  { %v492_v43 = vpop.f32.mrf.mxu1  ;;  %v3093_v44 = vpop.f32.mrf.mxu0 }
 0x237   :  { %v493_v19 = vadd.f32 %v2751_v37, %v492_v43 }
 0x238   :  { %v3038_v45 = vpop.f32.mrf.mxu1 }
 0x239   :  { %v3857_v46 = vadd.f32 %v3038_v45, %v2751_v37 }
 0x23a   :  { %v502_v47 = vpop.f32.mrf.mxu1 }
 0x23b   :  { %v3859_v48 = vadd.f32 %v2751_v37, %v502_v47 }
 0x23c   :  { %v3041_v49 = vpop.f32.mrf.mxu1 }
 0x23d   :  { %v3861_v50 = vadd.f32 %v3041_v49, %v2751_v37 }
 0x23e   :  { %v512_v52 = vpop.f32.mrf.mxu1 }
 0x23f   :  { %v3863_v53 = vadd.f32 %v2751_v37, %v512_v52  ;;  %v905_v52 = vpop.permute.xlu0 %904 }
 0x240   :  { %v3044_v54 = vpop.f32.mrf.mxu1 }
 0x241   :  { %v3865_v56 = vadd.f32 %v3044_v54, %v2751_v37 }
 0x242   :  { %v522_v57 = vpop.f32.mrf.mxu1 }
 0x243   :  { %v3867_v60 = vadd.f32 %v2751_v37, %v522_v57  ;;  %v607_v37 = vadd.f32 %v3813_v7, %v3820_v13 }
 0x244   :  { %v729_v8 = vpop.f32.mrf.mxu1 }
 0x245   :  { %v879_v9 = vadd.f32 %v729_v8, %v379_v59 }
 0x246   :  { %v3071_v14 = vpop.f32.mrf.mxu1 }
 0x247   :  { %v2770_v16 = vmul.f32 -1.442695, %v879_v9 }
 0x249   :  { %3346 = vpow2.f32 %v2770_v16 }
 0x24c   :  { %v799_v20 = vpop.f32.mrf.mxu1 }
 0x24d   :  { %v886_v23 = vadd.f32 %v799_v20, %v493_v19 }
 0x24e   :  { %v3082_v24 = vpop.f32.mrf.mxu1 }
 0x24f   :  { %v2771_v27 = vmul.f32 -1.442695, %v886_v23 }
 0x251   :  { %3348 = vpow2.f32 %v2771_v27 }
 0x256   :  { %v3347_v28 = vpop.eup %3346 }
 0x257   :  { %v883_v31 = vadd.f32 1.0, %v3347_v28 }
 0x259   :  { %3350 = vrcp.f32 %v883_v31 }
 0x25e   :  { %v3349_v32 = vpop.eup %3348 }
 0x25f   :  { %v890_v12 = vadd.f32 1.0, %v3349_v32 }
 0x261   :  { %3352 = vrcp.f32 %v890_v12 }
 0x266   :  { %v3351_v36 = vpop.eup %3350 }
 0x267   :  { %v893_v40 = vmul.f32 %v3351_v36, %v876_v35 }
 0x269   :  { %v894_v43 = vadd.f32 %v893_v40, %v607_v37 }
 0x26b   :  { %3354 = vtanh.f32 %v894_v43 }
 0x26e   :  { %v3353_v44 = vpop.eup %3352 }
 0x26f   :  { %v896_v45 = vsub.f32 1.0, %v3353_v44  ;;  %v1150_v44 = vpop.permute.xlu1 %1149 }
 0x278   :  { %v3355_v47 = vpop.eup %3354 }
 0x279   :  { %v897_v49 = vmul.f32 %v3355_v47, %v896_v45 }
 0x27b   :  { %v3877_v54 = vmul.f32 %v905_v52, %v897_v49 }
 0x27d   :  { %3103 = vmatmul.mubr.msk.f32.vlgmr.msra.gmra.mxu1 %vm659_vm4, %v3877_v54  ;;  %3114 = vmatmul.mubr.msk.f32.vlgmr.msra.gmra.mxu0 %vm659_vm4, %v3877_v54 }
 0x27e   :  { %3117 = vmatpush3.msra.mxu1 %v3672_v51  ;;  %3124 = vmatprep.mubr.msk.f32.mxu1 %vm3502_vm3, %v3501_v15 }
 0x27f   :  { %3118 = vmatprep.subr.mxu1 %v3501_v15  ;;  %3128 = vmatpush3.msra.mxu0 %v3717_v62 }
 0x280   :  { %3119 = vmatpush3.msra.mxu1 %v3683_v55  ;;  %3129 = vmatprep.subr.mxu0 %v3501_v15 }
 0x281   :  { %3120 = vmatprep.subr.mxu1 %v3501_v15  ;;  %3130 = vmatpush3.msra.mxu0 %v3726_v63 }
 0x282   :  { %3121 = vmatpush3.msra.mxu1 %v3695_v58  ;;  %3131 = vmatprep.subr.mxu0 %v3501_v15 }
 0x283   :  { %3122 = vmatprep.subr.mxu1 %v3501_v15  ;;  %3132 = vmatpush3.msra.mxu0 %v3740_v1 }
 0x284   :  { %3123 = vmatpush3.msra.mxu1 %v3706_v61  ;;  %3133 = vmatprep.subr.mxu0 %v3501_v15 }
 0x285   :  { %3125 = vmatmul.mubr.msk.f32.vlgmr.msra.gmra.mxu1 %vm659_vm4, %v3877_v54  ;;  %3138 = vmatprep.subr.mxu1 %v3501_v15 }
 0x286   :  { %3139 = vmatpush3.msra.mxu1 %v3734_v0  ;;  %3134 = vmatpush3.msra.mxu0 %v3750_v2 }
 0x287   :  { %3140 = vmatprep.subr.mxu1 %v3501_v15  ;;  %3135 = vmatprep.mubr.msk.f32.mxu0 %vm3502_vm3, %v3501_v15 }
 0x288   :  { %3141 = vmatpush3.msra.mxu1 %v3757_v3  ;;  %3146 = vmatprep.mubr.msk.f32.mxu1 %vm3502_vm3, %v3501_v15 }
 0x289   :  { %3142 = vmatprep.subr.mxu1 %v3501_v15  ;;  %3149 = vmatprep.subr.mxu0 %v3501_v15 }
 0x28a   :  { %3143 = vmatpush3.msra.mxu1 %v3768_v4 }
 0x28b   :  { %3144 = vmatprep.subr.mxu1 %v3501_v15 }
 0x28c   :  { %3145 = vmatpush3.msra.mxu1 %v3775_v5 }
 0x28d   :  { %3160 = vmatprep.subr.mxu1 %v3501_v15 }
 0x33d   :  { %v978_v7 = vpop.f32.mrf.mxu1  ;;  %v1048_v13 = vpop.f32.mrf.mxu0 }
 0x33e   :  { %v1122_v41 = vadd.f32 %v978_v7, %v3815_v10  ;;  %v1129_v14 = vadd.f32 %v1048_v13, %v3855_v42 }
 0x33f   :  { %v3104_v57 = vpop.f32.mrf.mxu1  ;;  %v3115_v59 = vpop.f32.mrf.mxu0 }
 0x340   :  { %v2776_v8 = vmul.f32 -1.442695, %v1122_v41  ;;  %v2777_v19 = vmul.f32 -1.442695, %v1129_v14 }
 0x342   :  { %3356 = vpow2.f32 %v2776_v8 }
 0x343   :  { %3358 = vpow2.f32 %v2777_v19 }
 0x345   :  { %v1118_v9 = vpop.f32.mrf.mxu1 }
 0x346   :  { %v1119_v28 = vadd.f32 %v3872_v6, %v1118_v9 }
 0x347   :  { %v3126_v16 = vpop.f32.mrf.mxu1 }
 0x34f   :  { %v3357_v20 = vpop.eup %3356 }
 0x350   :  { %v1126_v23 = vadd.f32 1.0, %v3357_v20  ;;  %v3359_v24 = vpop.eup %3358 }
 0x351   :  { %v1133_v27 = vadd.f32 1.0, %v3359_v24 }
 0x352   :  { %3360 = vrcp.f32 %v1126_v23 }
 0x353   :  { %3362 = vrcp.f32 %v1133_v27 }
 0x35f   :  { %v3361_v31 = vpop.eup %3360 }
 0x360   :  { %v1136_v32 = vmul.f32 %v3361_v31, %v1119_v28  ;;  %v3363_v12 = vpop.eup %3362 }
 0x361   :  { %v1139_v36 = vsub.f32 1.0, %v3363_v12 }
 0x362   :  { %v1137_v10 = vadd.f32 %v1136_v32, %v3818_v11 }
 0x364   :  { %3364 = vtanh.f32 %v1137_v10 }
 0x371   :  { %v3365_v35 = vpop.eup %3364 }
 0x372   :  { %v1140_v42 = vsub.f32 %v3365_v35, %v3877_v54  ;;  %v1395_v35 = vpop.permute.xlu0 %1394 }
 0x374   :  { %v1141_v37 = vmul.f32 %v1140_v42, %v1139_v36 }
 0x376   :  { %v1142_v40 = vadd.f32 %v1141_v37, %v3877_v54 }
 0x378   :  { %v1146_v43 = vsub.f32 %v1142_v40, %v3877_v54 }
 0x37a   :  { %v1152_v45 = vmul.f32 %v1150_v44, %v1146_v43 }
 0x37c   :  { %v3923_v47 = vadd.f32 %v1152_v45, %v3877_v54 }
 0x37e   :  { %3136 = vmatmul.mubr.msk.f32.vlgmr.msra.gmra.mxu0 %vm659_vm4, %v3923_v47  ;;  %3147 = vmatmul.mubr.msk.f32.vlgmr.msra.gmra.mxu1 %vm659_vm4, %v3923_v47 }
 0x37f   :  { %3150 = vmatpush3.msra.mxu0 %v3672_v51  ;;  %3157 = vmatprep.mubr.msk.f32.mxu0 %vm3502_vm3, %v3501_v15 }
 0x380   :  { %3151 = vmatprep.subr.mxu0 %v3501_v15  ;;  %3161 = vmatpush3.msra.mxu1 %v3717_v62 }
 0x381   :  { %3152 = vmatpush3.msra.mxu0 %v3683_v55  ;;  %3162 = vmatprep.subr.mxu1 %v3501_v15 }
 0x382   :  { %3153 = vmatprep.subr.mxu0 %v3501_v15  ;;  %3163 = vmatpush3.msra.mxu1 %v3726_v63 }
 0x383   :  { %3154 = vmatpush3.msra.mxu0 %v3695_v58  ;;  %3164 = vmatprep.subr.mxu1 %v3501_v15 }
 0x384   :  { %3155 = vmatprep.subr.mxu0 %v3501_v15  ;;  %3165 = vmatpush3.msra.mxu1 %v3740_v1 }
 0x385   :  { %3156 = vmatpush3.msra.mxu0 %v3706_v61  ;;  %3166 = vmatprep.subr.mxu1 %v3501_v15 }
 0x386   :  { %3158 = vmatmul.mubr.msk.f32.vlgmr.msra.gmra.mxu0 %vm659_vm4, %v3923_v47  ;;  %3171 = vmatprep.subr.mxu0 %v3501_v15 }
 0x387   :  { %3172 = vmatpush3.msra.mxu0 %v3734_v0  ;;  %3167 = vmatpush3.msra.mxu1 %v3750_v2 }
 0x388   :  { %3173 = vmatprep.subr.mxu0 %v3501_v15  ;;  %3168 = vmatprep.mubr.msk.f32.mxu1 %vm3502_vm3, %v3501_v15 }
 0x389   :  { %3174 = vmatpush3.msra.mxu0 %v3757_v3  ;;  %3179 = vmatprep.mubr.msk.f32.mxu0 %vm3502_vm3, %v3501_v15 }
 0x38a   :  { %3175 = vmatprep.subr.mxu0 %v3501_v15  ;;  %3182 = vmatprep.subr.mxu1 %v3501_v15 }
 0x38b   :  { %3176 = vmatpush3.msra.mxu0 %v3768_v4 }
 0x38c   :  { %3177 = vmatprep.subr.mxu0 %v3501_v15 }
 0x38d   :  { %3178 = vmatpush3.msra.mxu0 %v3775_v5 }
 0x38e   :  { %3193 = vmatprep.subr.mxu0 %v3501_v15 }
 0x43e   :  { %v1223_v11 = vpop.f32.mrf.mxu0  ;;  %v1293_v49 = vpop.f32.mrf.mxu1 }
 0x43f   :  { %v1367_v52 = vadd.f32 %v1223_v11, %v3827_v21  ;;  %v1374_v57 = vadd.f32 %v1293_v49, %v3859_v48 }
 0x440   :  { %v3137_v54 = vpop.f32.mrf.mxu0  ;;  %v3148_v7 = vpop.f32.mrf.mxu1 }
 0x441   :  { %v2782_v13 = vmul.f32 -1.442695, %v1367_v52  ;;  %v2783_v8 = vmul.f32 -1.442695, %v1374_v57 }
 0x443   :  { %3366 = vpow2.f32 %v2782_v13 }
 0x444   :  { %3368 = vpow2.f32 %v2783_v8 }
 0x446   :  { %v1363_v41 = vpop.f32.mrf.mxu0 }
 0x447   :  { %v1364_v20 = vadd.f32 %v3872_v6, %v1363_v41 }
 0x448   :  { %v3159_v59 = vpop.f32.mrf.mxu0 }
 0x450   :  { %v3367_v9 = vpop.eup %3366 }
 0x451   :  { %v1371_v14 = vadd.f32 1.0, %v3367_v9  ;;  %v3369_v16 = vpop.eup %3368 }
 0x452   :  { %v1378_v19 = vadd.f32 1.0, %v3369_v16 }
 0x453   :  { %3370 = vrcp.f32 %v1371_v14 }
 0x454   :  { %3372 = vrcp.f32 %v1378_v19 }
 0x460   :  { %v3371_v23 = vpop.eup %3370 }
 0x461   :  { %v1381_v24 = vmul.f32 %v3371_v23, %v1364_v20  ;;  %v3373_v27 = vpop.eup %3372 }
 0x462   :  { %v1384_v31 = vsub.f32 1.0, %v3373_v27 }
 0x463   :  { %v1382_v21 = vadd.f32 %v1381_v24, %v3830_v22  ;;  %v1640_v24 = vpop.permute.xlu1 %1639 }
 0x465   :  { %3374 = vtanh.f32 %v1382_v21 }
 0x472   :  { %v3375_v28 = vpop.eup %3374 }
 0x473   :  { %v1385_v48 = vsub.f32 %v3375_v28, %v3923_v47 }
 0x475   :  { %v1386_v32 = vmul.f32 %v1385_v48, %v1384_v31 }
 0x477   :  { %v1387_v10 = vadd.f32 %v1386_v32, %v3923_v47 }
 0x479   :  { %v1391_v12 = vsub.f32 %v1387_v10, %v3923_v47 }
 0x47b   :  { %v1397_v36 = vmul.f32 %v1395_v35, %v1391_v12 }
 0x47d   :  { %v3969_v42 = vadd.f32 %v1397_v36, %v3923_v47 }
 0x47f   :  { %3169 = vmatmul.mubr.msk.f32.vlgmr.msra.gmra.mxu1 %vm659_vm4, %v3969_v42  ;;  %3180 = vmatmul.mubr.msk.f32.vlgmr.msra.gmra.mxu0 %vm659_vm4, %v3969_v42 }
 0x480   :  { %3183 = vmatpush3.msra.mxu1 %v3672_v51  ;;  %3190 = vmatprep.mubr.msk.f32.mxu1 %vm3502_vm3, %v3501_v15 }
 0x481   :  { %3184 = vmatprep.subr.mxu1 %v3501_v15  ;;  %3194 = vmatpush3.msra.mxu0 %v3717_v62 }
 0x482   :  { %3185 = vmatpush3.msra.mxu1 %v3683_v55  ;;  %3195 = vmatprep.subr.mxu0 %v3501_v15 }
 0x483   :  { %3186 = vmatprep.subr.mxu1 %v3501_v15  ;;  %3196 = vmatpush3.msra.mxu0 %v3726_v63 }
 0x484   :  { %3187 = vmatpush3.msra.mxu1 %v3695_v58  ;;  %3197 = vmatprep.subr.mxu0 %v3501_v15 }
 0x485   :  { %3188 = vmatprep.subr.mxu1 %v3501_v15  ;;  %3198 = vmatpush3.msra.mxu0 %v3740_v1 }
 0x486   :  { %3189 = vmatpush3.msra.mxu1 %v3706_v61  ;;  %3199 = vmatprep.subr.mxu0 %v3501_v15 }
 0x487   :  { %3191 = vmatmul.mubr.msk.f32.vlgmr.msra.gmra.mxu1 %vm659_vm4, %v3969_v42  ;;  %3204 = vmatprep.subr.mxu1 %v3501_v15 }
 0x488   :  { %3205 = vmatpush3.msra.mxu1 %v3734_v0  ;;  %3200 = vmatpush3.msra.mxu0 %v3750_v2 }
 0x489   :  { %3206 = vmatprep.subr.mxu1 %v3501_v15  ;;  %3201 = vmatprep.mubr.msk.f32.mxu0 %vm3502_vm3, %v3501_v15 }
 0x48a   :  { %3207 = vmatpush3.msra.mxu1 %v3757_v3  ;;  %3212 = vmatprep.mubr.msk.f32.mxu1 %vm3502_vm3, %v3501_v15 }
 0x48b   :  { %3208 = vmatprep.subr.mxu1 %v3501_v15  ;;  %3215 = vmatprep.subr.mxu0 %v3501_v15 }
 0x48c   :  { %3209 = vmatpush3.msra.mxu1 %v3768_v4 }
 0x48d   :  { %3210 = vmatprep.subr.mxu1 %v3501_v15 }
 0x48e   :  { %3211 = vmatpush3.msra.mxu1 %v3775_v5 }
 0x48f   :  { %3226 = vmatprep.subr.mxu1 %v3501_v15 }
 0x53f   :  { %v1468_v22 = vpop.f32.mrf.mxu1  ;;  %v1538_v37 = vpop.f32.mrf.mxu0 }
 0x540   :  { %v1612_v40 = vadd.f32 %v1468_v22, %v3822_v17  ;;  %v1619_v11 = vadd.f32 %v1538_v37, %v3857_v46 }
 0x541   :  { %v3170_v43 = vpop.f32.mrf.mxu1  ;;  %v3181_v44 = vpop.f32.mrf.mxu0 }
 0x542   :  { %v2788_v45 = vmul.f32 -1.442695, %v1612_v40  ;;  %v2789_v52 = vmul.f32 -1.442695, %v1619_v11 }
 0x544   :  { %3376 = vpow2.f32 %v2788_v45 }
 0x545   :  { %3378 = vpow2.f32 %v2789_v52 }
 0x547   :  { %v1608_v47 = vpop.f32.mrf.mxu1 }
 0x548   :  { %v1609_v57 = vadd.f32 %v3872_v6, %v1608_v47 }
 0x549   :  { %v3192_v49 = vpop.f32.mrf.mxu1 }
 0x551   :  { %v3377_v54 = vpop.eup %3376 }
 0x552   :  { %v1616_v7 = vadd.f32 1.0, %v3377_v54  ;;  %v3379_v13 = vpop.eup %3378 }
 0x553   :  { %v1623_v41 = vadd.f32 1.0, %v3379_v13 }
 0x554   :  { %3380 = vrcp.f32 %v1616_v7 }
 0x555   :  { %3382 = vrcp.f32 %v1623_v41  ;;  %v1885_v41 = vpop.permute.xlu0 %1884 }
 0x561   :  { %v3381_v59 = vpop.eup %3380 }
 0x562   :  { %v1626_v8 = vmul.f32 %v3381_v59, %v1609_v57  ;;  %v3383_v9 = vpop.eup %3382 }
 0x563   :  { %v1629_v16 = vsub.f32 1.0, %v3383_v9 }
 0x564   :  { %v1627_v17 = vadd.f32 %v1626_v8, %v3825_v18 }
 0x566   :  { %3384 = vtanh.f32 %v1627_v17 }
 0x573   :  { %v3385_v14 = vpop.eup %3384 }
 0x574   :  { %v1630_v46 = vsub.f32 %v3385_v14, %v3969_v42 }
 0x576   :  { %v1631_v19 = vmul.f32 %v1630_v46, %v1629_v16 }
 0x578   :  { %v1632_v20 = vadd.f32 %v1631_v19, %v3969_v42 }
 0x57a   :  { %v1636_v23 = vsub.f32 %v1632_v20, %v3969_v42 }
 0x57c   :  { %v1642_v21 = vmul.f32 %v1640_v24, %v1636_v23 }
 0x57e   :  { %v4015_v27 = vadd.f32 %v1642_v21, %v3969_v42 }
 0x580   :  { %3202 = vmatmul.mubr.msk.f32.vlgmr.msra.gmra.mxu0 %vm659_vm4, %v4015_v27  ;;  %3213 = vmatmul.mubr.msk.f32.vlgmr.msra.gmra.mxu1 %vm659_vm4, %v4015_v27 }
 0x581   :  { %3216 = vmatpush3.msra.mxu0 %v3672_v51  ;;  %3223 = vmatprep.mubr.msk.f32.mxu0 %vm3502_vm3, %v3501_v15 }
 0x582   :  { %3217 = vmatprep.subr.mxu0 %v3501_v15  ;;  %3227 = vmatpush3.msra.mxu1 %v3717_v62 }
 0x583   :  { %3218 = vmatpush3.msra.mxu0 %v3683_v55  ;;  %3228 = vmatprep.subr.mxu1 %v3501_v15 }
 0x584   :  { %3219 = vmatprep.subr.mxu0 %v3501_v15  ;;  %3229 = vmatpush3.msra.mxu1 %v3726_v63 }
 0x585   :  { %3220 = vmatpush3.msra.mxu0 %v3695_v58  ;;  %3230 = vmatprep.subr.mxu1 %v3501_v15 }
 0x586   :  { %3221 = vmatprep.subr.mxu0 %v3501_v15  ;;  %3231 = vmatpush3.msra.mxu1 %v3740_v1 }
 0x587   :  { %3222 = vmatpush3.msra.mxu0 %v3706_v61  ;;  %3232 = vmatprep.subr.mxu1 %v3501_v15 }
 0x588   :  { %3224 = vmatmul.mubr.msk.f32.vlgmr.msra.gmra.mxu0 %vm659_vm4, %v4015_v27  ;;  %3237 = vmatprep.subr.mxu0 %v3501_v15 }
 0x589   :  { %3238 = vmatpush3.msra.mxu0 %v3734_v0  ;;  %3233 = vmatpush3.msra.mxu1 %v3750_v2 }
 0x58a   :  { %3239 = vmatprep.subr.mxu0 %v3501_v15  ;;  %3234 = vmatprep.mubr.msk.f32.mxu1 %vm3502_vm3, %v3501_v15 }
 0x58b   :  { %3240 = vmatpush3.msra.mxu0 %v3757_v3  ;;  %3245 = vmatprep.mubr.msk.f32.mxu0 %vm3502_vm3, %v3501_v15 }
 0x58c   :  { %3241 = vmatprep.subr.mxu0 %v3501_v15  ;;  %3248 = vmatprep.subr.mxu1 %v3501_v15 }
 0x58d   :  { %3242 = vmatpush3.msra.mxu0 %v3768_v4 }
 0x58e   :  { %3243 = vmatprep.subr.mxu0 %v3501_v15 }
 0x58f   :  { %3244 = vmatpush3.msra.mxu0 %v3775_v5 }
 0x590   :  { %3259 = vmatprep.subr.mxu0 %v3501_v15 }
 0x640   :  { %v1713_v18 = vpop.f32.mrf.mxu0  ;;  %v1783_v28 = vpop.f32.mrf.mxu1 }
 0x641   :  { %v1857_v31 = vadd.f32 %v1713_v18, %v3837_v29  ;;  %v1864_v35 = vadd.f32 %v1783_v28, %v3863_v53 }
 0x642   :  { %v3203_v48 = vpop.f32.mrf.mxu0  ;;  %v3214_v32 = vpop.f32.mrf.mxu1 }
 0x643   :  { %v2794_v10 = vmul.f32 -1.442695, %v1857_v31  ;;  %v2795_v42 = vmul.f32 -1.442695, %v1864_v35 }
 0x645   :  { %3386 = vpow2.f32 %v2794_v10 }
 0x646   :  { %3388 = vpow2.f32 %v2795_v42 }
 0x648   :  { %v1853_v12 = vpop.f32.mrf.mxu0 }
 0x649   :  { %v1854_v44 = vadd.f32 %v3872_v6, %v1853_v12 }
 0x64a   :  { %v3225_v36 = vpop.f32.mrf.mxu0 }
 0x652   :  { %v3387_v22 = vpop.eup %3386 }
 0x653   :  { %v1861_v37 = vadd.f32 1.0, %v3387_v22  ;;  %v3389_v40 = vpop.eup %3388  ;;  %v2130_v22 = vpop.permute.xlu1 %2129 }
 0x654   :  { %v1868_v43 = vadd.f32 1.0, %v3389_v40 }
 0x655   :  { %3390 = vrcp.f32 %v1861_v37 }
 0x656   :  { %3392 = vrcp.f32 %v1868_v43 }
 0x662   :  { %v3391_v45 = vpop.eup %3390 }
 0x663   :  { %v1871_v47 = vmul.f32 %v3391_v45, %v1854_v44  ;;  %v3393_v11 = vpop.eup %3392 }
 0x664   :  { %v1874_v52 = vsub.f32 1.0, %v3393_v11 }
 0x665   :  { %v1872_v29 = vadd.f32 %v1871_v47, %v3840_v30 }
 0x667   :  { %3394 = vtanh.f32 %v1872_v29 }
 0x674   :  { %v3395_v49 = vpop.eup %3394 }
 0x675   :  { %v1875_v53 = vsub.f32 %v3395_v49, %v4015_v27 }
 0x677   :  { %v1876_v54 = vmul.f32 %v1875_v53, %v1874_v52 }
 0x679   :  { %v1877_v7 = vadd.f32 %v1876_v54, %v4015_v27 }
 0x67b   :  { %v1881_v13 = vsub.f32 %v1877_v7, %v4015_v27  ;;  %v2375_v7 = vpop.permute.xlu0 %2374 }
 0x67d   :  { %v1887_v57 = vmul.f32 %v1885_v41, %v1881_v13 }
 0x67f   :  { %v4061_v59 = vadd.f32 %v1887_v57, %v4015_v27  ;;  %v3427_v57 = vld [vmem:[%s4209_s8 + $0x10] sm:$0xff] }
 0x681   :  { %3235 = vmatmul.mubr.msk.f32.vlgmr.msra.gmra.mxu1 %vm659_vm4, %v4061_v59  ;;  %3246 = vmatmul.mubr.msk.f32.vlgmr.msra.gmra.mxu0 %vm659_vm4, %v4061_v59 }
 0x682   :  { %3249 = vmatpush3.msra.mxu1 %v3672_v51  ;;  %3256 = vmatprep.mubr.msk.f32.mxu1 %vm3502_vm3, %v3501_v15 }
 0x683   :  { %3250 = vmatprep.subr.mxu1 %v3501_v15  ;;  %3260 = vmatpush3.msra.mxu0 %v3717_v62 }
 0x684   :  { %3251 = vmatpush3.msra.mxu1 %v3683_v55  ;;  %3261 = vmatprep.subr.mxu0 %v3501_v15 }
 0x685   :  { %3252 = vmatprep.subr.mxu1 %v3501_v15  ;;  %3262 = vmatpush3.msra.mxu0 %v3726_v63 }
 0x686   :  { %3253 = vmatpush3.msra.mxu1 %v3695_v58  ;;  %3263 = vmatprep.subr.mxu0 %v3501_v15 }
 0x687   :  { %3254 = vmatprep.subr.mxu1 %v3501_v15  ;;  %3264 = vmatpush3.msra.mxu0 %v3740_v1 }
 0x688   :  { %3255 = vmatpush3.msra.mxu1 %v3706_v61  ;;  %3265 = vmatprep.subr.mxu0 %v3501_v15 }
 0x689   :  { %3257 = vmatmul.mubr.msk.f32.vlgmr.msra.gmra.mxu1 %vm659_vm4, %v4061_v59  ;;  %3270 = vmatprep.subr.mxu1 %v3501_v15 }
 0x68a   :  { %3271 = vmatpush3.msra.mxu1 %v3734_v0  ;;  %3266 = vmatpush3.msra.mxu0 %v3750_v2 }
 0x68b   :  { %3272 = vmatprep.subr.mxu1 %v3501_v15  ;;  %3267 = vmatprep.mubr.msk.f32.mxu0 %vm3502_vm3, %v3501_v15 }
 0x68c   :  { %3273 = vmatpush3.msra.mxu1 %v3757_v3  ;;  %3278 = vmatprep.mubr.msk.f32.mxu1 %vm3502_vm3, %v3501_v15 }
 0x68d   :  { %3274 = vmatprep.subr.mxu1 %v3501_v15  ;;  %3281 = vmatprep.subr.mxu0 %v3501_v15 }
 0x68e   :  { %3275 = vmatpush3.msra.mxu1 %v3768_v4 }
 0x68f   :  { %3276 = vmatprep.subr.mxu1 %v3501_v15 }
 0x690   :  { %3277 = vmatpush3.msra.mxu1 %v3775_v5 }
 0x691   :  { %3292 = vmatprep.subr.mxu1 %v3501_v15 }
 0x741   :  { %v1958_v30 = vpop.f32.mrf.mxu1  ;;  %v2028_v8 = vpop.f32.mrf.mxu0 }
 0x742   :  { %v2102_v17 = vadd.f32 %v1958_v30, %v3832_v25  ;;  %v2109_v19 = vadd.f32 %v2028_v8, %v3861_v50  ;;  %v3429_v30 = vld [vmem:[%s4209_s8] sm:$0xff]  ;;  %v2627_v8 = vld [vmem:[%s4214_s13 + $0x18] sm:$0xff] }
 0x743   :  { %v3236_v9 = vpop.f32.mrf.mxu1  ;;  %v3247_v14 = vpop.f32.mrf.mxu0 }
 0x744   :  { %v2800_v16 = vmul.f32 -1.442695, %v2102_v17  ;;  %v2801_v23 = vmul.f32 -1.442695, %v2109_v19  ;;  %v2626_v17 = vld [vmem:[%s4214_s13 + $0x10] sm:$0xff]  ;;  %v2625_v9 = vld [vmem:[%s4214_s13 + $0x8] sm:$0xff] }
 0x745   :  { %v2624_v14 = vld [vmem:[%s4214_s13] sm:$0xff] }
 0x746   :  { %3396 = vpow2.f32 %v2800_v16 }
 0x747   :  { %3398 = vpow2.f32 %v2801_v23 }
 0x749   :  { %v2098_v46 = vpop.f32.mrf.mxu1 }
 0x74a   :  { %v2099_v28 = vadd.f32 %v3872_v6, %v2098_v46 }
 0x74b   :  { %v3258_v20 = vpop.f32.mrf.mxu1 }
 0x753   :  { %v3397_v24 = vpop.eup %3396 }
 0x754   :  { %v2106_v21 = vadd.f32 1.0, %v3397_v24  ;;  %v3399_v27 = vpop.eup %3398 }
 0x755   :  { %v2113_v18 = vadd.f32 1.0, %v3399_v27 }
 0x756   :  { %3400 = vrcp.f32 %v2106_v21 }
 0x757   :  { %3402 = vrcp.f32 %v2113_v18 }
 0x763   :  { %v3401_v31 = vpop.eup %3400 }
 0x764   :  { %v2116_v48 = vmul.f32 %v3401_v31, %v2099_v28  ;;  %v3403_v32 = vpop.eup %3402 }
 0x765   :  { %v2119_v12 = vsub.f32 1.0, %v3403_v32 }
 0x766   :  { %v2117_v25 = vadd.f32 %v2116_v48, %v3835_v26 }
 0x768   :  { %3404 = vtanh.f32 %v2117_v25 }
 0x775   :  { %v3405_v10 = vpop.eup %3404 }
 0x776   :  { %v2120_v50 = vsub.f32 %v3405_v10, %v4061_v59 }
 0x778   :  { %v2121_v35 = vmul.f32 %v2120_v50, %v2119_v12 }
 0x77a   :  { %v2122_v36 = vadd.f32 %v2121_v35, %v4061_v59 }
 0x77c   :  { %v2126_v42 = vsub.f32 %v2122_v36, %v4061_v59 }
 0x77e   :  { %v2132_v37 = vmul.f32 %v2130_v22, %v2126_v42 }
 0x780   :  { %v4107_v40 = vadd.f32 %v2132_v37, %v4061_v59  ;;  %v3428_v59 = vld [vmem:[%s4209_s8 + $0x8] sm:$0xff] }
 0x782   :  { %3268 = vmatmul.mubr.msk.f32.vlgmr.msra.gmra.mxu0 %vm659_vm4, %v4107_v40  ;;  %3279 = vmatmul.mubr.msk.f32.vlgmr.msra.gmra.mxu1 %vm659_vm4, %v4107_v40 }
 0x783   :  { %3282 = vmatpush3.msra.mxu0 %v3672_v51  ;;  %3289 = vmatprep.mubr.msk.f32.mxu0 %vm3502_vm3, %v3501_v15 }
 0x784   :  { %3283 = vmatprep.subr.mxu0 %v3501_v15  ;;  %3293 = vmatpush3.msra.mxu1 %v3717_v62 }
 0x785   :  { %3284 = vmatpush3.msra.mxu0 %v3683_v55  ;;  %3294 = vmatprep.subr.mxu1 %v3501_v15 }
 0x786   :  { %3285 = vmatprep.subr.mxu0 %v3501_v15  ;;  %3295 = vmatpush3.msra.mxu1 %v3726_v63 }
 0x787   :  { %3286 = vmatpush3.msra.mxu0 %v3695_v58  ;;  %3296 = vmatprep.subr.mxu1 %v3501_v15 }
 0x788   :  { %3287 = vmatprep.subr.mxu0 %v3501_v15  ;;  %3297 = vmatpush3.msra.mxu1 %v3740_v1 }
 0x789   :  { %3288 = vmatpush3.msra.mxu0 %v3706_v61  ;;  %3298 = vmatprep.subr.mxu1 %v3501_v15 }
 0x78a   :  { %3290 = vmatmul.mubr.msk.f32.vlgmr.msra.gmra.mxu0 %vm659_vm4, %v4107_v40  ;;  %3303 = vmatprep.subr.mxu0 %v3501_v15 }
 0x78b   :  { %3304 = vmatpush3.msra.mxu0 %v3734_v0  ;;  %3299 = vmatpush3.msra.mxu1 %v3750_v2 }
 0x78c   :  { %3305 = vmatprep.subr.mxu0 %v3501_v15  ;;  %3300 = vmatprep.mubr.msk.f32.mxu1 %vm3502_vm3, %v3501_v15 }
 0x78d   :  { %3306 = vmatpush3.msra.mxu0 %v3757_v3  ;;  %3311 = vmatprep.mubr.msk.f32.mxu0 %vm3502_vm3, %v3501_v15 }
 0x78e   :  { %3307 = vmatprep.subr.mxu0 %v3501_v15  ;;  %3314 = vmatprep.subr.mxu1 %v3501_v15 }
 0x78f   :  { %3308 = vmatpush3.msra.mxu0 %v3768_v4 }
 0x790   :  { %3309 = vmatprep.subr.mxu0 %v3501_v15 }
 0x791   :  { %3310 = vmatpush3.msra.mxu0 %v3775_v5 }
 0x792   :  { %3325 = vmatprep.subr.mxu0 %v3501_v15 }
 0x842   :  { %v2203_v51 = vpop.f32.mrf.mxu0  ;;  %v2273_v55 = vpop.f32.mrf.mxu1 }
 0x843   :  { %v2347_v58 = vadd.f32 %v2203_v51, %v3850_v38  ;;  %v2354_v1 = vadd.f32 %v2273_v55, %v3867_v60 }
 0x844   :  { %v3269_v61 = vpop.f32.mrf.mxu0  ;;  %v3280_v62 = vpop.f32.mrf.mxu1 }
 0x845   :  { %v2806_v63 = vmul.f32 -1.442695, %v2347_v58  ;;  %v2807_v3 = vmul.f32 -1.442695, %v2354_v1 }
 0x847   :  { %3406 = vpow2.f32 %v2806_v63 }
 0x848   :  { %3408 = vpow2.f32 %v2807_v3 }
 0x84a   :  { %v2343_v0 = vpop.f32.mrf.mxu0 }
 0x84b   :  { %v2344_v44 = vadd.f32 %v3872_v6, %v2343_v0 }
 0x84c   :  { %v3291_v2 = vpop.f32.mrf.mxu0 }
 0x854   :  { %v3407_v4 = vpop.eup %3406 }
 0x855   :  { %v2351_v26 = vadd.f32 1.0, %v3407_v4  ;;  %v3409_v5 = vpop.eup %3408 }
 0x856   :  { %v2358_v43 = vadd.f32 1.0, %v3409_v5 }
 0x857   :  { %3410 = vrcp.f32 %v2351_v26 }
 0x858   :  { %3412 = vrcp.f32 %v2358_v43 }
 0x864   :  { %v3411_v45 = vpop.eup %3410 }
 0x865   :  { %v2361_v47 = vmul.f32 %v3411_v45, %v2344_v44  ;;  %v3413_v29 = vpop.eup %3412 }
 0x866   :  { %v2364_v49 = vsub.f32 1.0, %v3413_v29 }
 0x867   :  { %v2362_v38 = vadd.f32 %v2361_v47, %v3853_v39  ;;  %v3426_v39 = vld [vmem:[%s4209_s8 + $0x18] sm:$0xff] }
 0x869   :  { %3414 = vtanh.f32 %v2362_v38 }
 0x876   :  { %v3415_v11 = vpop.eup %3414 }
 0x877   :  { %v2365_v60 = vsub.f32 %v3415_v11, %v4107_v40 }
 0x879   :  { %v2366_v52 = vmul.f32 %v2365_v60, %v2364_v49 }
 0x87b   :  { %v2367_v53 = vadd.f32 %v2366_v52, %v4107_v40 }
 0x87d   :  { %v2371_v54 = vsub.f32 %v2367_v53, %v4107_v40 }
 0x87f   :  { %v2377_v13 = vmul.f32 %v2375_v7, %v2371_v54 }
 0x881   :  { %v2378_v41 = vadd.f32 %v2377_v13, %v4107_v40  ;;  %v2620_v40 = vpop.permute.xlu1 %2619 }
 0x883   :  { %3301 = vmatmul.mubr.msk.f32.vlgmr.msra.gmra.mxu1 %vm659_vm4, %v2378_v41  ;;  %3312 = vmatmul.mubr.msk.f32.vlgmr.msra.gmra.mxu0 %vm659_vm4, %v2378_v41 }
 0x884   :  { %3315 = vmatpush3.msra.mxu1 %v3426_v39  ;;  %3322 = vmatprep.mubr.msk.f32.mxu1 %vm3502_vm3, %v3501_v15 }
 0x885   :  { %3316 = vmatprep.subr.mxu1 %v3501_v15  ;;  %3333 = vmatprep.mubr.msk.f32.mxu0 %vm3502_vm3, %v3501_v15 }
 0x886   :  { %3317 = vmatpush3.msra.mxu1 %v3427_v57  ;;  %3326 = vmatpush3.msra.mxu0 %v2627_v8 }
 0x887   :  { %3318 = vmatprep.subr.mxu1 %v3501_v15  ;;  %3327 = vmatprep.subr.mxu0 %v3501_v15 }
 0x888   :  { %3319 = vmatpush3.msra.mxu1 %v3428_v59  ;;  %3328 = vmatpush3.msra.mxu0 %v2626_v17 }
 0x889   :  { %3320 = vmatprep.subr.mxu1 %v3501_v15  ;;  %3329 = vmatprep.subr.mxu0 %v3501_v15 }
 0x88a   :  { %3321 = vmatpush3.msra.mxu1 %v3429_v30  ;;  %3330 = vmatpush3.msra.mxu0 %v2625_v9 }
 0x88b   :  { %3323 = vmatmul.mubr.msk.f32.vlgmr.msra.gmra.mxu1 %vm659_vm4, %v2378_v41  ;;  %3331 = vmatprep.subr.mxu0 %v3501_v15 }
 0x88c   :  { %3332 = vmatpush3.msra.mxu0 %v2624_v14 }
 0x943   :  { %v2448_v16 = vpop.f32.mrf.mxu1  ;;  %v2518_v46 = vpop.f32.mrf.mxu0 }
 0x944   :  { %v2592_v19 = vadd.f32 %v2448_v16, %v3842_v33  ;;  %v2599_v27 = vadd.f32 %v2518_v46, %v3865_v56 }
 0x945   :  { %v3302_v20 = vpop.f32.mrf.mxu1  ;;  %v3313_v23 = vpop.f32.mrf.mxu0 }
 0x946   :  { %v2812_v24 = vmul.f32 -1.442695, %v2592_v19  ;;  %v2813_v28 = vmul.f32 -1.442695, %v2599_v27 }
 0x948   :  { %3416 = vpow2.f32 %v2812_v24 }
 0x949   :  { %3418 = vpow2.f32 %v2813_v28 }
 0x94b   :  { %v2588_v21 = vpop.f32.mrf.mxu1 }
 0x94c   :  { %v2589_v32 = vadd.f32 %v3872_v6, %v2588_v21  ;;  %v2815_v6 = vld [vmem:[%s4215_s14] ss:$0 sm:$0xff] }
 0x94d   :  { %v3324_v18 = vpop.f32.mrf.mxu1 }
 0x955   :  { %v3417_v31 = vpop.eup %3416 }
 0x956   :  { %v2596_v48 = vadd.f32 1.0, %v3417_v31  ;;  %v3419_v25 = vpop.eup %3418 }
 0x957   :  { %v2603_v15 = vadd.f32 1.0, %v3419_v25 }
 0x958   :  { %3420 = vrcp.f32 %v2596_v48 }
 0x959   :  { %3422 = vrcp.f32 %v2603_v15 }
 0x965   :  { %v3421_v10 = vpop.eup %3420 }
 0x966   :  { %v2606_v12 = vmul.f32 %v3421_v10, %v2589_v32  ;;  %v3423_v50 = vpop.eup %3422 }
 0x967   :  { %v2609_v36 = vsub.f32 1.0, %v3423_v50 }
 0x968   :  { %v2607_v33 = vadd.f32 %v2606_v12, %v3845_v34 }
 0x96a   :  { %3424 = vtanh.f32 %v2607_v33 }
 0x977   :  { %v3425_v35 = vpop.eup %3424 }
 0x978   :  { %v2610_v56 = vsub.f32 %v3425_v35, %v2378_v41 }
 0x97a   :  { %v2611_v42 = vmul.f32 %v2610_v56, %v2609_v36 }
 0x97c   :  { %v2612_v22 = vadd.f32 %v2611_v42, %v2378_v41 }
 0x97e   :  { %v2616_v37 = vsub.f32 %v2612_v22, %v2378_v41 }
 0x980   :  { %v2622_v51 = vmul.f32 %v2620_v40, %v2616_v37 }
 0x982   :  { %v2623_v55 = vadd.f32 %v2622_v51, %v2378_v41 }
 0x984   :  { %3334 = vmatmul.mubr.msk.f32.vlgmr.msra.gmra.mxu0 %vm659_vm4, %v2623_v55 }
 0xa44   :  { %v2704_v34 = vpop.f32.mrf.mxu0 }
 0xa45   :  { %v2705_v58 = vadd.f32 %v2815_v6, %v2704_v34 }
 0xa46   :  { %v3335_v61 = vpop.f32.mrf.mxu0 }
 0xa47   :  { %2708 = vst [vmem:[#allocation7] sm:$0xff] %v2705_v58 }
 0xa48   :  { %3481 = shalt.err (!%p3478_p0)
}
 0xa49   :  { %2718 = dma.vmem_to_hbm [thread:$0]  %s2716_s29, 128, %s4216_s15, [#allocation4]  }
 0xa4a   :  { %3494 = dma.done.wait [#allocation4], 128  }
 0xa4b   :  { %3495 = vsyncadd [#allocation4], 4294967168 }
 0xa4c   :  { %2722 = vsyncpa [#allocation3], 1 }
 0xa4d   :  { %2723 = vsyncpa [#allocation6], 1 }
 0xa4e   :  { %2724 = vsyncpa [#allocation4], 1 }

</bundles_post_ra>
